<compile_context>
chip_gen: v5e
topology: v5e:2x2
jax: 0.10.0
libtpu: 0.0.40
codegen_flags: <defaults>
</compile_context>

<pallas_src>
import jax
import jax.numpy as jnp
from jax import lax
from jax.experimental import pallas as pl
from jax.experimental.pallas import tpu as pltpu


# ----------------------------- Pallas kernel ------------------------------

def _build_kernel(num_layers, hidden_size, seq_len, batch_pad):
    """Fused multi-layer-LSTM + FC kernel for static (L, H, T, B_pad)."""
    L, H, T, B = num_layers, hidden_size, seq_len, batch_pad

    def kernel(*refs):
        # refs layout:
        #   [0]                x_ref      (T*B, D)      time-major, flattened
        #   [1 .. 3L]          per layer: w_ih_t (d,4H), w_hh_t (H,4H), b (1,4H)
        #   [3L+1], [3L+2]     w_fc (H, O_pad), b_fc (1, O_pad)
        #   [3L+3]             o_ref (B, O_pad)
        #   [3L+4]             proj_ref (T*B, 4H)   scratch (hoisted layer-0 proj)
        #   [3L+5 ..]          scratch: h_l, c_l (B, H) per layer
        x_ref = refs[0]
        layer_refs = refs[1:1 + 3 * L]
        wfc_ref = refs[1 + 3 * L]
        bfc_ref = refs[2 + 3 * L]
        o_ref = refs[3 + 3 * L]
        proj_ref = refs[4 + 3 * L]
        state = refs[5 + 3 * L:]

        # zero-init hidden / cell state (PyTorch default h0 = c0 = 0)
        for s in state:
            s[...] = jnp.zeros_like(s)

        # ---- Hoisted layer-0 input projection for ALL timesteps at once ----
        # (T*B, D) @ (D, 4H) + bias  ->  proj scratch.  Off the serial chain;
        # M = T*B gives much better MXU fill than per-step (B, D) matmuls.
        proj_ref[...] = (
            jnp.dot(x_ref[...], layer_refs[0][...],
                    preferred_element_type=jnp.float32)
            + layer_refs[2][...])

        def lstm_cell(pre_gates, whh_ref, h_ref, c_ref):
            # pre_gates already contains the input projection + combined bias.
            gates = pre_gates + jnp.dot(h_ref[...], whh_ref[...],
                                        preferred_element_type=jnp.float32)
            # Activate the whole 128-lane gates vreg once, slice afterwards.
            sig = jax.nn.sigmoid(gates)          # 1 EUP pass (all 4H lanes)
            tnh = jnp.tanh(gates)                # 1 EUP pass (all 4H lanes)
            # PyTorch gate order: i, f, g, o
            i_g = sig[:, 0 * H:1 * H]
            f_g = sig[:, 1 * H:2 * H]
            o_g = sig[:, 3 * H:4 * H]
            g_g = tnh[:, 2 * H:3 * H]
            c_new = f_g * c_ref[...] + i_g * g_g
            h_new = o_g * jnp.tanh(c_new)        # 3rd (and last) EUP pass
            c_ref[...] = c_new
            h_ref[...] = h_new
            return h_new

        def step(t, carry):
            row = pl.multiple_of(t * B, B)
            # Layer 0: pre-activation gates come from the hoisted projection.
            pre = proj_ref[pl.ds(row, B), :]
            h_prev = lstm_cell(pre, layer_refs[1], state[0], state[1])
            # Layers >= 1: input projection of the fresh hidden state + bias.
            for l in range(1, L):
                wih = layer_refs[3 * l]
                whh = layer_refs[3 * l + 1]
                b = layer_refs[3 * l + 2]
                pre = (jnp.dot(h_prev, wih[...],
                               preferred_element_type=jnp.float32) + b[...])
                h_prev = lstm_cell(pre, whh, state[2 * l], state[2 * l + 1])
            return carry

        # Fully unroll only short sequences (keeps compile time / vreg pressure
        # bounded if seq_len ever grows).
        lax.fori_loop(0, T, step, 0, unroll=bool(T <= 32))

        # FC on last-layer hidden state at the final timestep (== out[:, -1, :])
        h_last = state[2 * (L - 1)][...]                    # (B, H)
        out = (jnp.dot(h_last, wfc_ref[...],
                       preferred_element_type=jnp.float32) + bfc_ref[...])
        o_ref[...] = out.astype(o_ref.dtype)                # lane-dense (B, O_pad)

    return kernel


def _full_spec(shape):
    n = len(shape)
    return pl.BlockSpec(shape, lambda *idx, _n=n: (0,) * _n)


# ----------------------------- parameter prep -----------------------------

def init_params(key, input_size, hidden_size, num_layers, output_size):
    """Raw PyTorch-layout parameters (W_ih (4H,d), W_hh (4H,H), biases, FC)."""
    H = hidden_size
    keys = jax.random.split(key, 4 * num_layers + 2)
    scale = 1.0 / jnp.sqrt(H)
    w_ih, w_hh, b_ih, b_hh = [], [], [], []
    for l in range(num_layers):
        d = input_size if l == 0 else H
        k0, k1, k2, k3 = keys[4 * l:4 * l + 4]
        w_ih.append(jax.random.uniform(k0, (4 * H, d), jnp.float32, -scale, scale))
        w_hh.append(jax.random.uniform(k1, (4 * H, H), jnp.float32, -scale, scale))
        b_ih.append(jax.random.uniform(k2, (4 * H,), jnp.float32, -scale, scale))
        b_hh.append(jax.random.uniform(k3, (4 * H,), jnp.float32, -scale, scale))
    fc_w = jax.random.uniform(keys[-2], (output_size, H), jnp.float32, -scale, scale)
    fc_b = jax.random.uniform(keys[-1], (output_size,), jnp.float32, -scale, scale)
    return {"w_ih": w_ih, "w_hh": w_hh, "b_ih": b_ih, "b_hh": b_hh,
            "fc_w": fc_w, "fc_b": fc_b}


def prepare_params(raw, lane=128):
    """One-time re-layout of weights into the kernel's canonical layout."""
    L = len(raw["w_ih"])
    H = raw["w_hh"][0].shape[1]
    O = raw["fc_w"].shape[0]
    O_pad = ((O + lane - 1) // lane) * lane
    layers = []
    for l in range(L):
        wih_t = jnp.asarray(raw["w_ih"][l].T)                       # (d, 4H)
        whh_t = jnp.asarray(raw["w_hh"][l].T)                       # (H, 4H)
        b = (raw["b_ih"][l] + raw["b_hh"][l]).reshape(1, 4 * H)     # (1, 4H)
        layers.append((wih_t, whh_t, b))
    wfc = jnp.zeros((H, O_pad), jnp.float32).at[:, :O].set(raw["fc_w"].T)
    bfc = jnp.zeros((1, O_pad), jnp.float32).at[:, :O].set(raw["fc_b"][None, :])
    return {"layers": layers, "wfc": wfc, "bfc": bfc,
            "hidden_size": H, "output_size": O, "output_size_padded": O_pad}


# ------------------------------ forward pass ------------------------------

def rnn_model_forward(x, kp):
    B, T, D = x.shape
    H = kp["hidden_size"]
    L = len(kp["layers"])
    O = kp["output_size"]
    O_pad = kp["output_size_padded"]

    # Pad batch to the f32 sublane count (8): states/gates/output become full
    # unmasked (8, 128) vregs instead of 2-of-8-sublane masked ones.
    B_pad = ((B + 7) // 8) * 8
    x_pad = jnp.zeros((B_pad, T, D), x.dtype).at[:B].set(x)
    # (B_pad, T, D) -> (T, B_pad, D) -> (T*B_pad, D): one batched layer-0
    # projection inside the kernel, and per-step rows are 8-aligned slices.
    x_2d = jnp.transpose(x_pad, (1, 0, 2)).reshape(T * B_pad, D)

    args = [x_2d]
    for (wih, whh, b) in kp["layers"]:
        args += [wih, whh, b]
    args += [kp["wfc"], kp["bfc"]]

    in_specs = [_full_spec(a.shape) for a in args]
    scratch = ([pltpu.VMEM((T * B_pad, 4 * H), jnp.float32)]          # hoisted proj
               + [pltpu.VMEM((B_pad, H), jnp.float32) for _ in range(2 * L)])

    # Advisory cost estimate (tiny kernel — keeps XLA from over-serializing).
    flops = 2 * (T * B_pad) * D * 4 * H                 # hoisted layer-0 projection
    flops += T * (2 * B_pad * H * 4 * H)                # layer-0 recurrent matmuls
    flops += T * (L - 1) * 2 * (2 * B_pad * H * 4 * H)  # layers >= 1: input + recurrent
    flops += 2 * B_pad * H * O_pad                      # FC
    transcendentals = T * L * (2 * B_pad * 4 * H + B_pad * H)
    bytes_accessed = 4 * (sum(int(a.size) for a in args) + B_pad * O_pad)

    out = pl.pallas_call(
        _build_kernel(L, H, T, B_pad),
        out_shape=jax.ShapeDtypeStruct((B_pad, O_pad), jnp.float32),
        grid=(1,),
        in_specs=in_specs,
        out_specs=_full_spec((B_pad, O_pad)),
        scratch_shapes=scratch,
        compiler_params=pltpu.CompilerParams(
            dimension_semantics=("arbitrary",)),
        cost_estimate=pl.CostEstimate(flops=int(flops),
                                      transcendentals=int(transcendentals),
                                      bytes_accessed=int(bytes_accessed)),
    )(*args)
    return out[:B, :O]


# --------------------------- pure-JAX reference ---------------------------

def rnn_model_reference(x, raw):
    B, T, _ = x.shape
    H = raw["w_hh"][0].shape[1]
    L = len(raw["w_ih"])
    hs = [jnp.zeros((B, H), jnp.float32) for _ in range(L)]
    cs = [jnp.zeros((B, H), jnp.float32) for _ in range(L)]
    for t in range(T):
        inp = x[:, t, :]
        for l in range(L):
            gates = (inp @ raw["w_ih"][l].T + hs[l] @ raw["w_hh"][l].T
                     + raw["b_ih"][l] + raw["b_hh"][l])
            i = jax.nn.sigmoid(gates[:, 0:H])
            f = jax.nn.sigmoid(gates[:, H:2 * H])
            g = jnp.tanh(gates[:, 2 * H:3 * H])
            o = jax.nn.sigmoid(gates[:, 3 * H:4 * H])
            cs[l] = f * cs[l] + i * g
            hs[l] = o * jnp.tanh(cs[l])
            inp = hs[l]
    return hs[-1] @ raw["fc_w"].T + raw["fc_b"]


# ----------------------------------- main -----------------------------------

if __name__ == "__main__":
    key = jax.random.PRNGKey(0)
    k_in, k_par = jax.random.split(key)

    # Small shapes consistent with the module:
    #   batch=2, seq_len=8, input_size=34 (17 joints * 2D),
    #   hidden_size=32, num_layers=2, output_size=75 (25 joints * 3D)
    B, T = 2, 8
    input_size, hidden_size, num_layers, output_size = 34, 32, 2, 75

    x = jax.random.normal(k_in, (B, T, input_size), jnp.float32)
    raw_params = init_params(k_par, input_size, hidden_size, num_layers, output_size)
    kernel_params = prepare_params(raw_params)   # one-time weight re-layout

    out = rnn_model_forward(x, kernel_params)
    out = jax.block_until_ready(out)

    ref = jax.block_until_ready(rnn_model_reference(x, raw_params))
    assert out.shape == (B, output_size)
    assert jnp.allclose(out, ref, atol=1e-4, rtol=1e-4), "mismatch vs reference"

    print("KERNEL_OK")
</pallas_src>

<mosaic_0001>
module attributes {stable_mosaic.version = 11 : i64} {
  func.func @kernel(%arg0: i32, %arg1: memref<64x34xf32, #tpu.memory_space<vmem>>, %arg2: memref<34x128xf32, #tpu.memory_space<vmem>>, %arg3: memref<32x128xf32, #tpu.memory_space<vmem>>, %arg4: memref<1x128xf32, #tpu.memory_space<vmem>>, %arg5: memref<32x128xf32, #tpu.memory_space<vmem>>, %arg6: memref<32x128xf32, #tpu.memory_space<vmem>>, %arg7: memref<1x128xf32, #tpu.memory_space<vmem>>, %arg8: memref<32x128xf32, #tpu.memory_space<vmem>>, %arg9: memref<1x128xf32, #tpu.memory_space<vmem>>, %arg10: memref<8x128xf32, #tpu.memory_space<vmem>>, %arg11: memref<64x128xf32, #tpu.memory_space<vmem>>, %arg12: memref<8x32xf32, #tpu.memory_space<vmem>>, %arg13: memref<8x32xf32, #tpu.memory_space<vmem>>, %arg14: memref<8x32xf32, #tpu.memory_space<vmem>>, %arg15: memref<8x32xf32, #tpu.memory_space<vmem>>) attributes {dimension_semantics = [#tpu.dimension_semantics<arbitrary>], iteration_bounds = array<i64: 1>, scalar_prefetch = 0 : i64, scratch_operands = 5 : i64, tpu.core_type = #tpu.core_type<tc>, window_params = [{pipeline_mode = #tpu.pipeline_mode<synchronous>, transform_indices = @transform_0, window_bounds = array<i64: 64, 34>}, {pipeline_mode = #tpu.pipeline_mode<synchronous>, transform_indices = @transform_1, window_bounds = array<i64: 34, 128>}, {pipeline_mode = #tpu.pipeline_mode<synchronous>, transform_indices = @transform_2, window_bounds = array<i64: 32, 128>}, {pipeline_mode = #tpu.pipeline_mode<synchronous>, transform_indices = @transform_3, window_bounds = array<i64: 1, 128>}, {pipeline_mode = #tpu.pipeline_mode<synchronous>, transform_indices = @transform_4, window_bounds = array<i64: 32, 128>}, {pipeline_mode = #tpu.pipeline_mode<synchronous>, transform_indices = @transform_5, window_bounds = array<i64: 32, 128>}, {pipeline_mode = #tpu.pipeline_mode<synchronous>, transform_indices = @transform_6, window_bounds = array<i64: 1, 128>}, {pipeline_mode = #tpu.pipeline_mode<synchronous>, transform_indices = @transform_7, window_bounds = array<i64: 32, 128>}, {pipeline_mode = #tpu.pipeline_mode<synchronous>, transform_indices = @transform_8, window_bounds = array<i64: 1, 128>}, {pipeline_mode = #tpu.pipeline_mode<synchronous>, transform_indices = @transform_9, window_bounds = array<i64: 8, 128>}]} {
    %cst = arith.constant 0.000000e+00 : f32
    %0 = vector.broadcast %cst : f32 to vector<8x32xf32>
    %c0 = arith.constant 0 : index
    %c0_0 = arith.constant 0 : index
    %1 = vector.load %arg12[%c0, %c0_0] : memref<8x32xf32, #tpu.memory_space<vmem>>, vector<8x32xf32>
    tpu.vector_store %arg12[%c0, %c0_0], %0 {strides = array<i32>} : memref<8x32xf32, #tpu.memory_space<vmem>>, vector<8x32xf32>,
    %cst_1 = arith.constant 0.000000e+00 : f32
    %2 = vector.broadcast %cst_1 : f32 to vector<8x32xf32>
    %c0_2 = arith.constant 0 : index
    %c0_3 = arith.constant 0 : index
    %3 = vector.load %arg13[%c0_2, %c0_3] : memref<8x32xf32, #tpu.memory_space<vmem>>, vector<8x32xf32>
    tpu.vector_store %arg13[%c0_2, %c0_3], %2 {strides = array<i32>} : memref<8x32xf32, #tpu.memory_space<vmem>>, vector<8x32xf32>,
    %cst_4 = arith.constant 0.000000e+00 : f32
    %4 = vector.broadcast %cst_4 : f32 to vector<8x32xf32>
    %c0_5 = arith.constant 0 : index
    %c0_6 = arith.constant 0 : index
    %5 = vector.load %arg14[%c0_5, %c0_6] : memref<8x32xf32, #tpu.memory_space<vmem>>, vector<8x32xf32>
    tpu.vector_store %arg14[%c0_5, %c0_6], %4 {strides = array<i32>} : memref<8x32xf32, #tpu.memory_space<vmem>>, vector<8x32xf32>,
    %cst_7 = arith.constant 0.000000e+00 : f32
    %6 = vector.broadcast %cst_7 : f32 to vector<8x32xf32>
    %c0_8 = arith.constant 0 : index
    %c0_9 = arith.constant 0 : index
    %7 = vector.load %arg15[%c0_8, %c0_9] : memref<8x32xf32, #tpu.memory_space<vmem>>, vector<8x32xf32>
    tpu.vector_store %arg15[%c0_8, %c0_9], %6 {strides = array<i32>} : memref<8x32xf32, #tpu.memory_space<vmem>>, vector<8x32xf32>,
    %c0_10 = arith.constant 0 : index
    %c0_11 = arith.constant 0 : index
    %8 = vector.load %arg1[%c0_10, %c0_11] : memref<64x34xf32, #tpu.memory_space<vmem>>, vector<64x34xf32>
    %c0_12 = arith.constant 0 : index
    %c0_13 = arith.constant 0 : index
    %9 = vector.load %arg2[%c0_12, %c0_13] : memref<34x128xf32, #tpu.memory_space<vmem>>, vector<34x128xf32>
    %cst_14 = arith.constant dense<0.000000e+00> : vector<64x128xf32>
    %10 = tpu.matmul %8, %9, %cst_14 {dimension_numbers = #tpu.dot_dimension_numbers<[1], [0], [0], [1], [0, 0, 1, 1], [], []>} : vector<64x34xf32>, vector<34x128xf32>, vector<64x128xf32> -> vector<64x128xf32>
    %c0_15 = arith.constant 0 : index
    %c0_16 = arith.constant 0 : index
    %11 = vector.load %arg4[%c0_15, %c0_16] : memref<1x128xf32, #tpu.memory_space<vmem>>, vector<1x128xf32>
    %12 = vector.broadcast %11 : vector<1x128xf32> to vector<64x128xf32>
    %13 = arith.addf %10, %12 : vector<64x128xf32>
    %c0_17 = arith.constant 0 : index
    %c0_18 = arith.constant 0 : index
    %14 = vector.load %arg11[%c0_17, %c0_18] : memref<64x128xf32, #tpu.memory_space<vmem>>, vector<64x128xf32>
    tpu.vector_store %arg11[%c0_17, %c0_18], %13 {strides = array<i32>} : memref<64x128xf32, #tpu.memory_space<vmem>>, vector<64x128xf32>,
    %c0_i32 = arith.constant 0 : i32
    %c8_i32 = arith.constant 8 : i32
    %15 = arith.muli %c0_i32, %c8_i32 : i32
    %16 = tpu.assume_multiple %15, 8 : i32
    %17 = arith.index_cast %16 : i32 to index
    %c0_19 = arith.constant 0 : index
    %18 = vector.load %arg11[%17, %c0_19] : memref<64x128xf32, #tpu.memory_space<vmem>>, vector<8x128xf32>
    %c0_20 = arith.constant 0 : index
    %c0_21 = arith.constant 0 : index
    %19 = vector.load %arg12[%c0_20, %c0_21] : memref<8x32xf32, #tpu.memory_space<vmem>>, vector<8x32xf32>
    %c0_22 = arith.constant 0 : index
    %c0_23 = arith.constant 0 : index
    %20 = vector.load %arg3[%c0_22, %c0_23] : memref<32x128xf32, #tpu.memory_space<vmem>>, vector<32x128xf32>
    %cst_24 = arith.constant dense<0.000000e+00> : vector<8x128xf32>
    %21 = tpu.matmul %19, %20, %cst_24 {dimension_numbers = #tpu.dot_dimension_numbers<[1], [0], [0], [1], [0, 0, 1, 1], [], []>} : vector<8x32xf32>, vector<32x128xf32>, vector<8x128xf32> -> vector<8x128xf32>
    %22 = arith.addf %18, %21 : vector<8x128xf32>
    %23 = arith.negf %22 : vector<8x128xf32>
    %24 = math.exp %23 : vector<8x128xf32>
    %cst_25 = arith.constant 1.000000e+00 : f32
    %25 = vector.broadcast %cst_25 : f32 to vector<8x128xf32>
    %26 = arith.addf %25, %24 : vector<8x128xf32>
    %27 = arith.divf %25, %26 : vector<8x128xf32>
    %28 = math.tanh %22 : vector<8x128xf32>
    %29 = vector.extract_strided_slice %27 {offsets = [0, 0], sizes = [8, 32], strides = [1, 1]} : vector<8x128xf32> to vector<8x32xf32>
    %30 = vector.extract_strided_slice %27 {offsets = [0, 32], sizes = [8, 32], strides = [1, 1]} : vector<8x128xf32> to vector<8x32xf32>
    %31 = vector.extract_strided_slice %27 {offsets = [0, 96], sizes = [8, 32], strides = [1, 1]} : vector<8x128xf32> to vector<8x32xf32>
    %32 = vector.extract_strided_slice %28 {offsets = [0, 64], sizes = [8, 32], strides = [1, 1]} : vector<8x128xf32> to vector<8x32xf32>
    %c0_26 = arith.constant 0 : index
    %c0_27 = arith.constant 0 : index
    %33 = vector.load %arg13[%c0_26, %c0_27] : memref<8x32xf32, #tpu.memory_space<vmem>>, vector<8x32xf32>
    %34 = arith.mulf %30, %33 : vector<8x32xf32>
    %35 = arith.mulf %29, %32 : vector<8x32xf32>
    %36 = arith.addf %34, %35 : vector<8x32xf32>
    %37 = math.tanh %36 : vector<8x32xf32>
    %38 = arith.mulf %31, %37 : vector<8x32xf32>
    %c0_28 = arith.constant 0 : index
    %c0_29 = arith.constant 0 : index
    %39 = vector.load %arg13[%c0_28, %c0_29] : memref<8x32xf32, #tpu.memory_space<vmem>>, vector<8x32xf32>
    tpu.vector_store %arg13[%c0_28, %c0_29], %36 {strides = array<i32>} : memref<8x32xf32, #tpu.memory_space<vmem>>, vector<8x32xf32>,
    %c0_30 = arith.constant 0 : index
    %c0_31 = arith.constant 0 : index
    %40 = vector.load %arg12[%c0_30, %c0_31] : memref<8x32xf32, #tpu.memory_space<vmem>>, vector<8x32xf32>
    tpu.vector_store %arg12[%c0_30, %c0_31], %38 {strides = array<i32>} : memref<8x32xf32, #tpu.memory_space<vmem>>, vector<8x32xf32>,
    %c0_32 = arith.constant 0 : index
    %c0_33 = arith.constant 0 : index
    %41 = vector.load %arg5[%c0_32, %c0_33] : memref<32x128xf32, #tpu.memory_space<vmem>>, vector<32x128xf32>
    %cst_34 = arith.constant dense<0.000000e+00> : vector<8x128xf32>
    %42 = tpu.matmul %38, %41, %cst_34 {dimension_numbers = #tpu.dot_dimension_numbers<[1], [0], [0], [1], [0, 0, 1, 1], [], []>} : vector<8x32xf32>, vector<32x128xf32>, vector<8x128xf32> -> vector<8x128xf32>
    %c0_35 = arith.constant 0 : index
    %c0_36 = arith.constant 0 : index
    %43 = vector.load %arg7[%c0_35, %c0_36] : memref<1x128xf32, #tpu.memory_space<vmem>>, vector<1x128xf32>
    %44 = vector.broadcast %43 : vector<1x128xf32> to vector<8x128xf32>
    %45 = arith.addf %42, %44 : vector<8x128xf32>
    %c0_37 = arith.constant 0 : index
    %c0_38 = arith.constant 0 : index
    %46 = vector.load %arg14[%c0_37, %c0_38] : memref<8x32xf32, #tpu.memory_space<vmem>>, vector<8x32xf32>
    %c0_39 = arith.constant 0 : index
    %c0_40 = arith.constant 0 : index
    %47 = vector.load %arg6[%c0_39, %c0_40] : memref<32x128xf32, #tpu.memory_space<vmem>>, vector<32x128xf32>
    %cst_41 = arith.constant dense<0.000000e+00> : vector<8x128xf32>
    %48 = tpu.matmul %46, %47, %cst_41 {dimension_numbers = #tpu.dot_dimension_numbers<[1], [0], [0], [1], [0, 0, 1, 1], [], []>} : vector<8x32xf32>, vector<32x128xf32>, vector<8x128xf32> -> vector<8x128xf32>
    %49 = arith.addf %45, %48 : vector<8x128xf32>
    %50 = arith.negf %49 : vector<8x128xf32>
    %51 = math.exp %50 : vector<8x128xf32>
    %cst_42 = arith.constant 1.000000e+00 : f32
    %52 = vector.broadcast %cst_42 : f32 to vector<8x128xf32>
    %53 = arith.addf %52, %51 : vector<8x128xf32>
    %54 = arith.divf %52, %53 : vector<8x128xf32>
    %55 = math.tanh %49 : vector<8x128xf32>
    %56 = vector.extract_strided_slice %54 {offsets = [0, 0], sizes = [8, 32], strides = [1, 1]} : vector<8x128xf32> to vector<8x32xf32>
    %57 = vector.extract_strided_slice %54 {offsets = [0, 32], sizes = [8, 32], strides = [1, 1]} : vector<8x128xf32> to vector<8x32xf32>
    %58 = vector.extract_strided_slice %54 {offsets = [0, 96], sizes = [8, 32], strides = [1, 1]} : vector<8x128xf32> to vector<8x32xf32>
    %59 = vector.extract_strided_slice %55 {offsets = [0, 64], sizes = [8, 32], strides = [1, 1]} : vector<8x128xf32> to vector<8x32xf32>
    %c0_43 = arith.constant 0 : index
    %c0_44 = arith.constant 0 : index
    %60 = vector.load %arg15[%c0_43, %c0_44] : memref<8x32xf32, #tpu.memory_space<vmem>>, vector<8x32xf32>
    %61 = arith.mulf %57, %60 : vector<8x32xf32>
    %62 = arith.mulf %56, %59 : vector<8x32xf32>
    %63 = arith.addf %61, %62 : vector<8x32xf32>
    %64 = math.tanh %63 : vector<8x32xf32>
    %65 = arith.mulf %58, %64 : vector<8x32xf32>
    %c0_45 = arith.constant 0 : index
    %c0_46 = arith.constant 0 : index
    %66 = vector.load %arg15[%c0_45, %c0_46] : memref<8x32xf32, #tpu.memory_space<vmem>>, vector<8x32xf32>
    tpu.vector_store %arg15[%c0_45, %c0_46], %63 {strides = array<i32>} : memref<8x32xf32, #tpu.memory_space<vmem>>, vector<8x32xf32>,
    %c0_47 = arith.constant 0 : index
    %c0_48 = arith.constant 0 : index
    %67 = vector.load %arg14[%c0_47, %c0_48] : memref<8x32xf32, #tpu.memory_space<vmem>>, vector<8x32xf32>
    tpu.vector_store %arg14[%c0_47, %c0_48], %65 {strides = array<i32>} : memref<8x32xf32, #tpu.memory_space<vmem>>, vector<8x32xf32>,
    %c1_i32 = arith.constant 1 : i32
    %c8_i32_49 = arith.constant 8 : i32
    %68 = arith.muli %c1_i32, %c8_i32_49 : i32
    %69 = tpu.assume_multiple %68, 8 : i32
    %70 = arith.index_cast %69 : i32 to index
    %c0_50 = arith.constant 0 : index
    %71 = vector.load %arg11[%70, %c0_50] : memref<64x128xf32, #tpu.memory_space<vmem>>, vector<8x128xf32>
    %c0_51 = arith.constant 0 : index
    %c0_52 = arith.constant 0 : index
    %72 = vector.load %arg12[%c0_51, %c0_52] : memref<8x32xf32, #tpu.memory_space<vmem>>, vector<8x32xf32>
    %c0_53 = arith.constant 0 : index
    %c0_54 = arith.constant 0 : index
    %73 = vector.load %arg3[%c0_53, %c0_54] : memref<32x128xf32, #tpu.memory_space<vmem>>, vector<32x128xf32>
    %cst_55 = arith.constant dense<0.000000e+00> : vector<8x128xf32>
    %74 = tpu.matmul %72, %73, %cst_55 {dimension_numbers = #tpu.dot_dimension_numbers<[1], [0], [0], [1], [0, 0, 1, 1], [], []>} : vector<8x32xf32>, vector<32x128xf32>, vector<8x128xf32> -> vector<8x128xf32>
    %75 = arith.addf %71, %74 : vector<8x128xf32>
    %76 = arith.negf %75 : vector<8x128xf32>
    %77 = math.exp %76 : vector<8x128xf32>
    %cst_56 = arith.constant 1.000000e+00 : f32
    %78 = vector.broadcast %cst_56 : f32 to vector<8x128xf32>
    %79 = arith.addf %78, %77 : vector<8x128xf32>
    %80 = arith.divf %78, %79 : vector<8x128xf32>
    %81 = math.tanh %75 : vector<8x128xf32>
    %82 = vector.extract_strided_slice %80 {offsets = [0, 0], sizes = [8, 32], strides = [1, 1]} : vector<8x128xf32> to vector<8x32xf32>
    %83 = vector.extract_strided_slice %80 {offsets = [0, 32], sizes = [8, 32], strides = [1, 1]} : vector<8x128xf32> to vector<8x32xf32>
    %84 = vector.extract_strided_slice %80 {offsets = [0, 96], sizes = [8, 32], strides = [1, 1]} : vector<8x128xf32> to vector<8x32xf32>
    %85 = vector.extract_strided_slice %81 {offsets = [0, 64], sizes = [8, 32], strides = [1, 1]} : vector<8x128xf32> to vector<8x32xf32>
    %c0_57 = arith.constant 0 : index
    %c0_58 = arith.constant 0 : index
    %86 = vector.load %arg13[%c0_57, %c0_58] : memref<8x32xf32, #tpu.memory_space<vmem>>, vector<8x32xf32>
    %87 = arith.mulf %83, %86 : vector<8x32xf32>
    %88 = arith.mulf %82, %85 : vector<8x32xf32>
    %89 = arith.addf %87, %88 : vector<8x32xf32>
    %90 = math.tanh %89 : vector<8x32xf32>
    %91 = arith.mulf %84, %90 : vector<8x32xf32>
    %c0_59 = arith.constant 0 : index
    %c0_60 = arith.constant 0 : index
    %92 = vector.load %arg13[%c0_59, %c0_60] : memref<8x32xf32, #tpu.memory_space<vmem>>, vector<8x32xf32>
    tpu.vector_store %arg13[%c0_59, %c0_60], %89 {strides = array<i32>} : memref<8x32xf32, #tpu.memory_space<vmem>>, vector<8x32xf32>,
    %c0_61 = arith.constant 0 : index
    %c0_62 = arith.constant 0 : index
    %93 = vector.load %arg12[%c0_61, %c0_62] : memref<8x32xf32, #tpu.memory_space<vmem>>, vector<8x32xf32>
    tpu.vector_store %arg12[%c0_61, %c0_62], %91 {strides = array<i32>} : memref<8x32xf32, #tpu.memory_space<vmem>>, vector<8x32xf32>,
    %c0_63 = arith.constant 0 : index
    %c0_64 = arith.constant 0 : index
    %94 = vector.load %arg5[%c0_63, %c0_64] : memref<32x128xf32, #tpu.memory_space<vmem>>, vector<32x128xf32>
    %cst_65 = arith.constant dense<0.000000e+00> : vector<8x128xf32>
    %95 = tpu.matmul %91, %94, %cst_65 {dimension_numbers = #tpu.dot_dimension_numbers<[1], [0], [0], [1], [0, 0, 1, 1], [], []>} : vector<8x32xf32>, vector<32x128xf32>, vector<8x128xf32> -> vector<8x128xf32>
    %c0_66 = arith.constant 0 : index
    %c0_67 = arith.constant 0 : index
    %96 = vector.load %arg7[%c0_66, %c0_67] : memref<1x128xf32, #tpu.memory_space<vmem>>, vector<1x128xf32>
    %97 = vector.broadcast %96 : vector<1x128xf32> to vector<8x128xf32>
    %98 = arith.addf %95, %97 : vector<8x128xf32>
    %c0_68 = arith.constant 0 : index
    %c0_69 = arith.constant 0 : index
    %99 = vector.load %arg14[%c0_68, %c0_69] : memref<8x32xf32, #tpu.memory_space<vmem>>, vector<8x32xf32>
    %c0_70 = arith.constant 0 : index
    %c0_71 = arith.constant 0 : index
    %100 = vector.load %arg6[%c0_70, %c0_71] : memref<32x128xf32, #tpu.memory_space<vmem>>, vector<32x128xf32>
    %cst_72 = arith.constant dense<0.000000e+00> : vector<8x128xf32>
    %101 = tpu.matmul %99, %100, %cst_72 {dimension_numbers = #tpu.dot_dimension_numbers<[1], [0], [0], [1], [0, 0, 1, 1], [], []>} : vector<8x32xf32>, vector<32x128xf32>, vector<8x128xf32> -> vector<8x128xf32>
    %102 = arith.addf %98, %101 : vector<8x128xf32>
    %103 = arith.negf %102 : vector<8x128xf32>
    %104 = math.exp %103 : vector<8x128xf32>
    %cst_73 = arith.constant 1.000000e+00 : f32
    %105 = vector.broadcast %cst_73 : f32 to vector<8x128xf32>
    %106 = arith.addf %105, %104 : vector<8x128xf32>
    %107 = arith.divf %105, %106 : vector<8x128xf32>
    %108 = math.tanh %102 : vector<8x128xf32>
    %109 = vector.extract_strided_slice %107 {offsets = [0, 0], sizes = [8, 32], strides = [1, 1]} : vector<8x128xf32> to vector<8x32xf32>
    %110 = vector.extract_strided_slice %107 {offsets = [0, 32], sizes = [8, 32], strides = [1, 1]} : vector<8x128xf32> to vector<8x32xf32>
    %111 = vector.extract_strided_slice %107 {offsets = [0, 96], sizes = [8, 32], strides = [1, 1]} : vector<8x128xf32> to vector<8x32xf32>
    %112 = vector.extract_strided_slice %108 {offsets = [0, 64], sizes = [8, 32], strides = [1, 1]} : vector<8x128xf32> to vector<8x32xf32>
    %c0_74 = arith.constant 0 : index
    %c0_75 = arith.constant 0 : index
    %113 = vector.load %arg15[%c0_74, %c0_75] : memref<8x32xf32, #tpu.memory_space<vmem>>, vector<8x32xf32>
    %114 = arith.mulf %110, %113 : vector<8x32xf32>
    %115 = arith.mulf %109, %112 : vector<8x32xf32>
    %116 = arith.addf %114, %115 : vector<8x32xf32>
    %117 = math.tanh %116 : vector<8x32xf32>
    %118 = arith.mulf %111, %117 : vector<8x32xf32>
    %c0_76 = arith.constant 0 : index
    %c0_77 = arith.constant 0 : index
    %119 = vector.load %arg15[%c0_76, %c0_77] : memref<8x32xf32, #tpu.memory_space<vmem>>, vector<8x32xf32>
    tpu.vector_store %arg15[%c0_76, %c0_77], %116 {strides = array<i32>} : memref<8x32xf32, #tpu.memory_space<vmem>>, vector<8x32xf32>,
    %c0_78 = arith.constant 0 : index
    %c0_79 = arith.constant 0 : index
    %120 = vector.load %arg14[%c0_78, %c0_79] : memref<8x32xf32, #tpu.memory_space<vmem>>, vector<8x32xf32>
    tpu.vector_store %arg14[%c0_78, %c0_79], %118 {strides = array<i32>} : memref<8x32xf32, #tpu.memory_space<vmem>>, vector<8x32xf32>,
    %c2_i32 = arith.constant 2 : i32
    %c8_i32_80 = arith.constant 8 : i32
    %121 = arith.muli %c2_i32, %c8_i32_80 : i32
    %122 = tpu.assume_multiple %121, 8 : i32
    %123 = arith.index_cast %122 : i32 to index
    %c0_81 = arith.constant 0 : index
    %124 = vector.load %arg11[%123, %c0_81] : memref<64x128xf32, #tpu.memory_space<vmem>>, vector<8x128xf32>
    %c0_82 = arith.constant 0 : index
    %c0_83 = arith.constant 0 : index
    %125 = vector.load %arg12[%c0_82, %c0_83] : memref<8x32xf32, #tpu.memory_space<vmem>>, vector<8x32xf32>
    %c0_84 = arith.constant 0 : index
    %c0_85 = arith.constant 0 : index
    %126 = vector.load %arg3[%c0_84, %c0_85] : memref<32x128xf32, #tpu.memory_space<vmem>>, vector<32x128xf32>
    %cst_86 = arith.constant dense<0.000000e+00> : vector<8x128xf32>
    %127 = tpu.matmul %125, %126, %cst_86 {dimension_numbers = #tpu.dot_dimension_numbers<[1], [0], [0], [1], [0, 0, 1, 1], [], []>} : vector<8x32xf32>, vector<32x128xf32>, vector<8x128xf32> -> vector<8x128xf32>
    %128 = arith.addf %124, %127 : vector<8x128xf32>
    %129 = arith.negf %128 : vector<8x128xf32>
    %130 = math.exp %129 : vector<8x128xf32>
    %cst_87 = arith.constant 1.000000e+00 : f32
    %131 = vector.broadcast %cst_87 : f32 to vector<8x128xf32>
    %132 = arith.addf %131, %130 : vector<8x128xf32>
    %133 = arith.divf %131, %132 : vector<8x128xf32>
    %134 = math.tanh %128 : vector<8x128xf32>
    %135 = vector.extract_strided_slice %133 {offsets = [0, 0], sizes = [8, 32], strides = [1, 1]} : vector<8x128xf32> to vector<8x32xf32>
    %136 = vector.extract_strided_slice %133 {offsets = [0, 32], sizes = [8, 32], strides = [1, 1]} : vector<8x128xf32> to vector<8x32xf32>
    %137 = vector.extract_strided_slice %133 {offsets = [0, 96], sizes = [8, 32], strides = [1, 1]} : vector<8x128xf32> to vector<8x32xf32>
    %138 = vector.extract_strided_slice %134 {offsets = [0, 64], sizes = [8, 32], strides = [1, 1]} : vector<8x128xf32> to vector<8x32xf32>
    %c0_88 = arith.constant 0 : index
    %c0_89 = arith.constant 0 : index
    %139 = vector.load %arg13[%c0_88, %c0_89] : memref<8x32xf32, #tpu.memory_space<vmem>>, vector<8x32xf32>
    %140 = arith.mulf %136, %139 : vector<8x32xf32>
    %141 = arith.mulf %135, %138 : vector<8x32xf32>
    %142 = arith.addf %140, %141 : vector<8x32xf32>
    %143 = math.tanh %142 : vector<8x32xf32>
    %144 = arith.mulf %137, %143 : vector<8x32xf32>
    %c0_90 = arith.constant 0 : index
    %c0_91 = arith.constant 0 : index
    %145 = vector.load %arg13[%c0_90, %c0_91] : memref<8x32xf32, #tpu.memory_space<vmem>>, vector<8x32xf32>
    tpu.vector_store %arg13[%c0_90, %c0_91], %142 {strides = array<i32>} : memref<8x32xf32, #tpu.memory_space<vmem>>, vector<8x32xf32>,
    %c0_92 = arith.constant 0 : index
    %c0_93 = arith.constant 0 : index
    %146 = vector.load %arg12[%c0_92, %c0_93] : memref<8x32xf32, #tpu.memory_space<vmem>>, vector<8x32xf32>
    tpu.vector_store %arg12[%c0_92, %c0_93], %144 {strides = array<i32>} : memref<8x32xf32, #tpu.memory_space<vmem>>, vector<8x32xf32>,
    %c0_94 = arith.constant 0 : index
    %c0_95 = arith.constant 0 : index
    %147 = vector.load %arg5[%c0_94, %c0_95] : memref<32x128xf32, #tpu.memory_space<vmem>>, vector<32x128xf32>
    %cst_96 = arith.constant dense<0.000000e+00> : vector<8x128xf32>
    %148 = tpu.matmul %144, %147, %cst_96 {dimension_numbers = #tpu.dot_dimension_numbers<[1], [0], [0], [1], [0, 0, 1, 1], [], []>} : vector<8x32xf32>, vector<32x128xf32>, vector<8x128xf32> -> vector<8x128xf32>
    %c0_97 = arith.constant 0 : index
    %c0_98 = arith.constant 0 : index
    %149 = vector.load %arg7[%c0_97, %c0_98] : memref<1x128xf32, #tpu.memory_space<vmem>>, vector<1x128xf32>
    %150 = vector.broadcast %149 : vector<1x128xf32> to vector<8x128xf32>
    %151 = arith.addf %148, %150 : vector<8x128xf32>
    %c0_99 = arith.constant 0 : index
    %c0_100 = arith.constant 0 : index
    %152 = vector.load %arg14[%c0_99, %c0_100] : memref<8x32xf32, #tpu.memory_space<vmem>>, vector<8x32xf32>
    %c0_101 = arith.constant 0 : index
    %c0_102 = arith.constant 0 : index
    %153 = vector.load %arg6[%c0_101, %c0_102] : memref<32x128xf32, #tpu.memory_space<vmem>>, vector<32x128xf32>
    %cst_103 = arith.constant dense<0.000000e+00> : vector<8x128xf32>
    %154 = tpu.matmul %152, %153, %cst_103 {dimension_numbers = #tpu.dot_dimension_numbers<[1], [0], [0], [1], [0, 0, 1, 1], [], []>} : vector<8x32xf32>, vector<32x128xf32>, vector<8x128xf32> -> vector<8x128xf32>
    %155 = arith.addf %151, %154 : vector<8x128xf32>
    %156 = arith.negf %155 : vector<8x128xf32>
    %157 = math.exp %156 : vector<8x128xf32>
    %cst_104 = arith.constant 1.000000e+00 : f32
    %158 = vector.broadcast %cst_104 : f32 to vector<8x128xf32>
    %159 = arith.addf %158, %157 : vector<8x128xf32>
    %160 = arith.divf %158, %159 : vector<8x128xf32>
    %161 = math.tanh %155 : vector<8x128xf32>
    %162 = vector.extract_strided_slice %160 {offsets = [0, 0], sizes = [8, 32], strides = [1, 1]} : vector<8x128xf32> to vector<8x32xf32>
    %163 = vector.extract_strided_slice %160 {offsets = [0, 32], sizes = [8, 32], strides = [1, 1]} : vector<8x128xf32> to vector<8x32xf32>
    %164 = vector.extract_strided_slice %160 {offsets = [0, 96], sizes = [8, 32], strides = [1, 1]} : vector<8x128xf32> to vector<8x32xf32>
    %165 = vector.extract_strided_slice %161 {offsets = [0, 64], sizes = [8, 32], strides = [1, 1]} : vector<8x128xf32> to vector<8x32xf32>
    %c0_105 = arith.constant 0 : index
    %c0_106 = arith.constant 0 : index
    %166 = vector.load %arg15[%c0_105, %c0_106] : memref<8x32xf32, #tpu.memory_space<vmem>>, vector<8x32xf32>
    %167 = arith.mulf %163, %166 : vector<8x32xf32>
    %168 = arith.mulf %162, %165 : vector<8x32xf32>
    %169 = arith.addf %167, %168 : vector<8x32xf32>
    %170 = math.tanh %169 : vector<8x32xf32>
    %171 = arith.mulf %164, %170 : vector<8x32xf32>
    %c0_107 = arith.constant 0 : index
    %c0_108 = arith.constant 0 : index
    %172 = vector.load %arg15[%c0_107, %c0_108] : memref<8x32xf32, #tpu.memory_space<vmem>>, vector<8x32xf32>
    tpu.vector_store %arg15[%c0_107, %c0_108], %169 {strides = array<i32>} : memref<8x32xf32, #tpu.memory_space<vmem>>, vector<8x32xf32>,
    %c0_109 = arith.constant 0 : index
    %c0_110 = arith.constant 0 : index
    %173 = vector.load %arg14[%c0_109, %c0_110] : memref<8x32xf32, #tpu.memory_space<vmem>>, vector<8x32xf32>
    tpu.vector_store %arg14[%c0_109, %c0_110], %171 {strides = array<i32>} : memref<8x32xf32, #tpu.memory_space<vmem>>, vector<8x32xf32>,
    %c3_i32 = arith.constant 3 : i32
    %c8_i32_111 = arith.constant 8 : i32
    %174 = arith.muli %c3_i32, %c8_i32_111 : i32
    %175 = tpu.assume_multiple %174, 8 : i32
    %176 = arith.index_cast %175 : i32 to index
    %c0_112 = arith.constant 0 : index
    %177 = vector.load %arg11[%176, %c0_112] : memref<64x128xf32, #tpu.memory_space<vmem>>, vector<8x128xf32>
    %c0_113 = arith.constant 0 : index
    %c0_114 = arith.constant 0 : index
    %178 = vector.load %arg12[%c0_113, %c0_114] : memref<8x32xf32, #tpu.memory_space<vmem>>, vector<8x32xf32>
    %c0_115 = arith.constant 0 : index
    %c0_116 = arith.constant 0 : index
    %179 = vector.load %arg3[%c0_115, %c0_116] : memref<32x128xf32, #tpu.memory_space<vmem>>, vector<32x128xf32>
    %cst_117 = arith.constant dense<0.000000e+00> : vector<8x128xf32>
    %180 = tpu.matmul %178, %179, %cst_117 {dimension_numbers = #tpu.dot_dimension_numbers<[1], [0], [0], [1], [0, 0, 1, 1], [], []>} : vector<8x32xf32>, vector<32x128xf32>, vector<8x128xf32> -> vector<8x128xf32>
    %181 = arith.addf %177, %180 : vector<8x128xf32>
    %182 = arith.negf %181 : vector<8x128xf32>
    %183 = math.exp %182 : vector<8x128xf32>
    %cst_118 = arith.constant 1.000000e+00 : f32
    %184 = vector.broadcast %cst_118 : f32 to vector<8x128xf32>
    %185 = arith.addf %184, %183 : vector<8x128xf32>
    %186 = arith.divf %184, %185 : vector<8x128xf32>
    %187 = math.tanh %181 : vector<8x128xf32>
    %188 = vector.extract_strided_slice %186 {offsets = [0, 0], sizes = [8, 32], strides = [1, 1]} : vector<8x128xf32> to vector<8x32xf32>
    %189 = vector.extract_strided_slice %186 {offsets = [0, 32], sizes = [8, 32], strides = [1, 1]} : vector<8x128xf32> to vector<8x32xf32>
    %190 = vector.extract_strided_slice %186 {offsets = [0, 96], sizes = [8, 32], strides = [1, 1]} : vector<8x128xf32> to vector<8x32xf32>
    %191 = vector.extract_strided_slice %187 {offsets = [0, 64], sizes = [8, 32], strides = [1, 1]} : vector<8x128xf32> to vector<8x32xf32>
    %c0_119 = arith.constant 0 : index
    %c0_120 = arith.constant 0 : index
    %192 = vector.load %arg13[%c0_119, %c0_120] : memref<8x32xf32, #tpu.memory_space<vmem>>, vector<8x32xf32>
    %193 = arith.mulf %189, %192 : vector<8x32xf32>
    %194 = arith.mulf %188, %191 : vector<8x32xf32>
    %195 = arith.addf %193, %194 : vector<8x32xf32>
    %196 = math.tanh %195 : vector<8x32xf32>
    %197 = arith.mulf %190, %196 : vector<8x32xf32>
    %c0_121 = arith.constant 0 : index
    %c0_122 = arith.constant 0 : index
    %198 = vector.load %arg13[%c0_121, %c0_122] : memref<8x32xf32, #tpu.memory_space<vmem>>, vector<8x32xf32>
    tpu.vector_store %arg13[%c0_121, %c0_122], %195 {strides = array<i32>} : memref<8x32xf32, #tpu.memory_space<vmem>>, vector<8x32xf32>,
    %c0_123 = arith.constant 0 : index
    %c0_124 = arith.constant 0 : index
    %199 = vector.load %arg12[%c0_123, %c0_124] : memref<8x32xf32, #tpu.memory_space<vmem>>, vector<8x32xf32>
    tpu.vector_store %arg12[%c0_123, %c0_124], %197 {strides = array<i32>} : memref<8x32xf32, #tpu.memory_space<vmem>>, vector<8x32xf32>,
    %c0_125 = arith.constant 0 : index
    %c0_126 = arith.constant 0 : index
    %200 = vector.load %arg5[%c0_125, %c0_126] : memref<32x128xf32, #tpu.memory_space<vmem>>, vector<32x128xf32>
    %cst_127 = arith.constant dense<0.000000e+00> : vector<8x128xf32>
    %201 = tpu.matmul %197, %200, %cst_127 {dimension_numbers = #tpu.dot_dimension_numbers<[1], [0], [0], [1], [0, 0, 1, 1], [], []>} : vector<8x32xf32>, vector<32x128xf32>, vector<8x128xf32> -> vector<8x128xf32>
    %c0_128 = arith.constant 0 : index
    %c0_129 = arith.constant 0 : index
    %202 = vector.load %arg7[%c0_128, %c0_129] : memref<1x128xf32, #tpu.memory_space<vmem>>, vector<1x128xf32>
    %203 = vector.broadcast %202 : vector<1x128xf32> to vector<8x128xf32>
    %204 = arith.addf %201, %203 : vector<8x128xf32>
    %c0_130 = arith.constant 0 : index
    %c0_131 = arith.constant 0 : index
    %205 = vector.load %arg14[%c0_130, %c0_131] : memref<8x32xf32, #tpu.memory_space<vmem>>, vector<8x32xf32>
    %c0_132 = arith.constant 0 : index
    %c0_133 = arith.constant 0 : index
    %206 = vector.load %arg6[%c0_132, %c0_133] : memref<32x128xf32, #tpu.memory_space<vmem>>, vector<32x128xf32>
    %cst_134 = arith.constant dense<0.000000e+00> : vector<8x128xf32>
    %207 = tpu.matmul %205, %206, %cst_134 {dimension_numbers = #tpu.dot_dimension_numbers<[1], [0], [0], [1], [0, 0, 1, 1], [], []>} : vector<8x32xf32>, vector<32x128xf32>, vector<8x128xf32> -> vector<8x128xf32>
    %208 = arith.addf %204, %207 : vector<8x128xf32>
    %209 = arith.negf %208 : vector<8x128xf32>
    %210 = math.exp %209 : vector<8x128xf32>
    %cst_135 = arith.constant 1.000000e+00 : f32
    %211 = vector.broadcast %cst_135 : f32 to vector<8x128xf32>
    %212 = arith.addf %211, %210 : vector<8x128xf32>
    %213 = arith.divf %211, %212 : vector<8x128xf32>
    %214 = math.tanh %208 : vector<8x128xf32>
    %215 = vector.extract_strided_slice %213 {offsets = [0, 0], sizes = [8, 32], strides = [1, 1]} : vector<8x128xf32> to vector<8x32xf32>
    %216 = vector.extract_strided_slice %213 {offsets = [0, 32], sizes = [8, 32], strides = [1, 1]} : vector<8x128xf32> to vector<8x32xf32>
    %217 = vector.extract_strided_slice %213 {offsets = [0, 96], sizes = [8, 32], strides = [1, 1]} : vector<8x128xf32> to vector<8x32xf32>
    %218 = vector.extract_strided_slice %214 {offsets = [0, 64], sizes = [8, 32], strides = [1, 1]} : vector<8x128xf32> to vector<8x32xf32>
    %c0_136 = arith.constant 0 : index
    %c0_137 = arith.constant 0 : index
    %219 = vector.load %arg15[%c0_136, %c0_137] : memref<8x32xf32, #tpu.memory_space<vmem>>, vector<8x32xf32>
    %220 = arith.mulf %216, %219 : vector<8x32xf32>
    %221 = arith.mulf %215, %218 : vector<8x32xf32>
    %222 = arith.addf %220, %221 : vector<8x32xf32>
    %223 = math.tanh %222 : vector<8x32xf32>
    %224 = arith.mulf %217, %223 : vector<8x32xf32>
    %c0_138 = arith.constant 0 : index
    %c0_139 = arith.constant 0 : index
    %225 = vector.load %arg15[%c0_138, %c0_139] : memref<8x32xf32, #tpu.memory_space<vmem>>, vector<8x32xf32>
    tpu.vector_store %arg15[%c0_138, %c0_139], %222 {strides = array<i32>} : memref<8x32xf32, #tpu.memory_space<vmem>>, vector<8x32xf32>,
    %c0_140 = arith.constant 0 : index
    %c0_141 = arith.constant 0 : index
    %226 = vector.load %arg14[%c0_140, %c0_141] : memref<8x32xf32, #tpu.memory_space<vmem>>, vector<8x32xf32>
    tpu.vector_store %arg14[%c0_140, %c0_141], %224 {strides = array<i32>} : memref<8x32xf32, #tpu.memory_space<vmem>>, vector<8x32xf32>,
    %c4_i32 = arith.constant 4 : i32
    %c8_i32_142 = arith.constant 8 : i32
    %227 = arith.muli %c4_i32, %c8_i32_142 : i32
    %228 = tpu.assume_multiple %227, 8 : i32
    %229 = arith.index_cast %228 : i32 to index
    %c0_143 = arith.constant 0 : index
    %230 = vector.load %arg11[%229, %c0_143] : memref<64x128xf32, #tpu.memory_space<vmem>>, vector<8x128xf32>
    %c0_144 = arith.constant 0 : index
    %c0_145 = arith.constant 0 : index
    %231 = vector.load %arg12[%c0_144, %c0_145] : memref<8x32xf32, #tpu.memory_space<vmem>>, vector<8x32xf32>
    %c0_146 = arith.constant 0 : index
    %c0_147 = arith.constant 0 : index
    %232 = vector.load %arg3[%c0_146, %c0_147] : memref<32x128xf32, #tpu.memory_space<vmem>>, vector<32x128xf32>
    %cst_148 = arith.constant dense<0.000000e+00> : vector<8x128xf32>
    %233 = tpu.matmul %231, %232, %cst_148 {dimension_numbers = #tpu.dot_dimension_numbers<[1], [0], [0], [1], [0, 0, 1, 1], [], []>} : vector<8x32xf32>, vector<32x128xf32>, vector<8x128xf32> -> vector<8x128xf32>
    %234 = arith.addf %230, %233 : vector<8x128xf32>
    %235 = arith.negf %234 : vector<8x128xf32>
    %236 = math.exp %235 : vector<8x128xf32>
    %cst_149 = arith.constant 1.000000e+00 : f32
    %237 = vector.broadcast %cst_149 : f32 to vector<8x128xf32>
    %238 = arith.addf %237, %236 : vector<8x128xf32>
    %239 = arith.divf %237, %238 : vector<8x128xf32>
    %240 = math.tanh %234 : vector<8x128xf32>
    %241 = vector.extract_strided_slice %239 {offsets = [0, 0], sizes = [8, 32], strides = [1, 1]} : vector<8x128xf32> to vector<8x32xf32>
    %242 = vector.extract_strided_slice %239 {offsets = [0, 32], sizes = [8, 32], strides = [1, 1]} : vector<8x128xf32> to vector<8x32xf32>
    %243 = vector.extract_strided_slice %239 {offsets = [0, 96], sizes = [8, 32], strides = [1, 1]} : vector<8x128xf32> to vector<8x32xf32>
    %244 = vector.extract_strided_slice %240 {offsets = [0, 64], sizes = [8, 32], strides = [1, 1]} : vector<8x128xf32> to vector<8x32xf32>
    %c0_150 = arith.constant 0 : index
    %c0_151 = arith.constant 0 : index
    %245 = vector.load %arg13[%c0_150, %c0_151] : memref<8x32xf32, #tpu.memory_space<vmem>>, vector<8x32xf32>
    %246 = arith.mulf %242, %245 : vector<8x32xf32>
    %247 = arith.mulf %241, %244 : vector<8x32xf32>
    %248 = arith.addf %246, %247 : vector<8x32xf32>
    %249 = math.tanh %248 : vector<8x32xf32>
    %250 = arith.mulf %243, %249 : vector<8x32xf32>
    %c0_152 = arith.constant 0 : index
    %c0_153 = arith.constant 0 : index
    %251 = vector.load %arg13[%c0_152, %c0_153] : memref<8x32xf32, #tpu.memory_space<vmem>>, vector<8x32xf32>
    tpu.vector_store %arg13[%c0_152, %c0_153], %248 {strides = array<i32>} : memref<8x32xf32, #tpu.memory_space<vmem>>, vector<8x32xf32>,
    %c0_154 = arith.constant 0 : index
    %c0_155 = arith.constant 0 : index
    %252 = vector.load %arg12[%c0_154, %c0_155] : memref<8x32xf32, #tpu.memory_space<vmem>>, vector<8x32xf32>
    tpu.vector_store %arg12[%c0_154, %c0_155], %250 {strides = array<i32>} : memref<8x32xf32, #tpu.memory_space<vmem>>, vector<8x32xf32>,
    %c0_156 = arith.constant 0 : index
    %c0_157 = arith.constant 0 : index
    %253 = vector.load %arg5[%c0_156, %c0_157] : memref<32x128xf32, #tpu.memory_space<vmem>>, vector<32x128xf32>
    %cst_158 = arith.constant dense<0.000000e+00> : vector<8x128xf32>
    %254 = tpu.matmul %250, %253, %cst_158 {dimension_numbers = #tpu.dot_dimension_numbers<[1], [0], [0], [1], [0, 0, 1, 1], [], []>} : vector<8x32xf32>, vector<32x128xf32>, vector<8x128xf32> -> vector<8x128xf32>
    %c0_159 = arith.constant 0 : index
    %c0_160 = arith.constant 0 : index
    %255 = vector.load %arg7[%c0_159, %c0_160] : memref<1x128xf32, #tpu.memory_space<vmem>>, vector<1x128xf32>
    %256 = vector.broadcast %255 : vector<1x128xf32> to vector<8x128xf32>
    %257 = arith.addf %254, %256 : vector<8x128xf32>
    %c0_161 = arith.constant 0 : index
    %c0_162 = arith.constant 0 : index
    %258 = vector.load %arg14[%c0_161, %c0_162] : memref<8x32xf32, #tpu.memory_space<vmem>>, vector<8x32xf32>
    %c0_163 = arith.constant 0 : index
    %c0_164 = arith.constant 0 : index
    %259 = vector.load %arg6[%c0_163, %c0_164] : memref<32x128xf32, #tpu.memory_space<vmem>>, vector<32x128xf32>
    %cst_165 = arith.constant dense<0.000000e+00> : vector<8x128xf32>
    %260 = tpu.matmul %258, %259, %cst_165 {dimension_numbers = #tpu.dot_dimension_numbers<[1], [0], [0], [1], [0, 0, 1, 1], [], []>} : vector<8x32xf32>, vector<32x128xf32>, vector<8x128xf32> -> vector<8x128xf32>
    %261 = arith.addf %257, %260 : vector<8x128xf32>
    %262 = arith.negf %261 : vector<8x128xf32>
    %263 = math.exp %262 : vector<8x128xf32>
    %cst_166 = arith.constant 1.000000e+00 : f32
    %264 = vector.broadcast %cst_166 : f32 to vector<8x128xf32>
    %265 = arith.addf %264, %263 : vector<8x128xf32>
    %266 = arith.divf %264, %265 : vector<8x128xf32>
    %267 = math.tanh %261 : vector<8x128xf32>
    %268 = vector.extract_strided_slice %266 {offsets = [0, 0], sizes = [8, 32], strides = [1, 1]} : vector<8x128xf32> to vector<8x32xf32>
    %269 = vector.extract_strided_slice %266 {offsets = [0, 32], sizes = [8, 32], strides = [1, 1]} : vector<8x128xf32> to vector<8x32xf32>
    %270 = vector.extract_strided_slice %266 {offsets = [0, 96], sizes = [8, 32], strides = [1, 1]} : vector<8x128xf32> to vector<8x32xf32>
    %271 = vector.extract_strided_slice %267 {offsets = [0, 64], sizes = [8, 32], strides = [1, 1]} : vector<8x128xf32> to vector<8x32xf32>
    %c0_167 = arith.constant 0 : index
    %c0_168 = arith.constant 0 : index
    %272 = vector.load %arg15[%c0_167, %c0_168] : memref<8x32xf32, #tpu.memory_space<vmem>>, vector<8x32xf32>
    %273 = arith.mulf %269, %272 : vector<8x32xf32>
    %274 = arith.mulf %268, %271 : vector<8x32xf32>
    %275 = arith.addf %273, %274 : vector<8x32xf32>
    %276 = math.tanh %275 : vector<8x32xf32>
    %277 = arith.mulf %270, %276 : vector<8x32xf32>
    %c0_169 = arith.constant 0 : index
    %c0_170 = arith.constant 0 : index
    %278 = vector.load %arg15[%c0_169, %c0_170] : memref<8x32xf32, #tpu.memory_space<vmem>>, vector<8x32xf32>
    tpu.vector_store %arg15[%c0_169, %c0_170], %275 {strides = array<i32>} : memref<8x32xf32, #tpu.memory_space<vmem>>, vector<8x32xf32>,
    %c0_171 = arith.constant 0 : index
    %c0_172 = arith.constant 0 : index
    %279 = vector.load %arg14[%c0_171, %c0_172] : memref<8x32xf32, #tpu.memory_space<vmem>>, vector<8x32xf32>
    tpu.vector_store %arg14[%c0_171, %c0_172], %277 {strides = array<i32>} : memref<8x32xf32, #tpu.memory_space<vmem>>, vector<8x32xf32>,
    %c5_i32 = arith.constant 5 : i32
    %c8_i32_173 = arith.constant 8 : i32
    %280 = arith.muli %c5_i32, %c8_i32_173 : i32
    %281 = tpu.assume_multiple %280, 8 : i32
    %282 = arith.index_cast %281 : i32 to index
    %c0_174 = arith.constant 0 : index
    %283 = vector.load %arg11[%282, %c0_174] : memref<64x128xf32, #tpu.memory_space<vmem>>, vector<8x128xf32>
    %c0_175 = arith.constant 0 : index
    %c0_176 = arith.constant 0 : index
    %284 = vector.load %arg12[%c0_175, %c0_176] : memref<8x32xf32, #tpu.memory_space<vmem>>, vector<8x32xf32>
    %c0_177 = arith.constant 0 : index
    %c0_178 = arith.constant 0 : index
    %285 = vector.load %arg3[%c0_177, %c0_178] : memref<32x128xf32, #tpu.memory_space<vmem>>, vector<32x128xf32>
    %cst_179 = arith.constant dense<0.000000e+00> : vector<8x128xf32>
    %286 = tpu.matmul %284, %285, %cst_179 {dimension_numbers = #tpu.dot_dimension_numbers<[1], [0], [0], [1], [0, 0, 1, 1], [], []>} : vector<8x32xf32>, vector<32x128xf32>, vector<8x128xf32> -> vector<8x128xf32>
    %287 = arith.addf %283, %286 : vector<8x128xf32>
    %288 = arith.negf %287 : vector<8x128xf32>
    %289 = math.exp %288 : vector<8x128xf32>
    %cst_180 = arith.constant 1.000000e+00 : f32
    %290 = vector.broadcast %cst_180 : f32 to vector<8x128xf32>
    %291 = arith.addf %290, %289 : vector<8x128xf32>
    %292 = arith.divf %290, %291 : vector<8x128xf32>
    %293 = math.tanh %287 : vector<8x128xf32>
    %294 = vector.extract_strided_slice %292 {offsets = [0, 0], sizes = [8, 32], strides = [1, 1]} : vector<8x128xf32> to vector<8x32xf32>
    %295 = vector.extract_strided_slice %292 {offsets = [0, 32], sizes = [8, 32], strides = [1, 1]} : vector<8x128xf32> to vector<8x32xf32>
    %296 = vector.extract_strided_slice %292 {offsets = [0, 96], sizes = [8, 32], strides = [1, 1]} : vector<8x128xf32> to vector<8x32xf32>
    %297 = vector.extract_strided_slice %293 {offsets = [0, 64], sizes = [8, 32], strides = [1, 1]} : vector<8x128xf32> to vector<8x32xf32>
    %c0_181 = arith.constant 0 : index
    %c0_182 = arith.constant 0 : index
    %298 = vector.load %arg13[%c0_181, %c0_182] : memref<8x32xf32, #tpu.memory_space<vmem>>, vector<8x32xf32>
    %299 = arith.mulf %295, %298 : vector<8x32xf32>
    %300 = arith.mulf %294, %297 : vector<8x32xf32>
    %301 = arith.addf %299, %300 : vector<8x32xf32>
    %302 = math.tanh %301 : vector<8x32xf32>
    %303 = arith.mulf %296, %302 : vector<8x32xf32>
    %c0_183 = arith.constant 0 : index
    %c0_184 = arith.constant 0 : index
    %304 = vector.load %arg13[%c0_183, %c0_184] : memref<8x32xf32, #tpu.memory_space<vmem>>, vector<8x32xf32>
    tpu.vector_store %arg13[%c0_183, %c0_184], %301 {strides = array<i32>} : memref<8x32xf32, #tpu.memory_space<vmem>>, vector<8x32xf32>,
    %c0_185 = arith.constant 0 : index
    %c0_186 = arith.constant 0 : index
    %305 = vector.load %arg12[%c0_185, %c0_186] : memref<8x32xf32, #tpu.memory_space<vmem>>, vector<8x32xf32>
    tpu.vector_store %arg12[%c0_185, %c0_186], %303 {strides = array<i32>} : memref<8x32xf32, #tpu.memory_space<vmem>>, vector<8x32xf32>,
    %c0_187 = arith.constant 0 : index
    %c0_188 = arith.constant 0 : index
    %306 = vector.load %arg5[%c0_187, %c0_188] : memref<32x128xf32, #tpu.memory_space<vmem>>, vector<32x128xf32>
    %cst_189 = arith.constant dense<0.000000e+00> : vector<8x128xf32>
    %307 = tpu.matmul %303, %306, %cst_189 {dimension_numbers = #tpu.dot_dimension_numbers<[1], [0], [0], [1], [0, 0, 1, 1], [], []>} : vector<8x32xf32>, vector<32x128xf32>, vector<8x128xf32> -> vector<8x128xf32>
    %c0_190 = arith.constant 0 : index
    %c0_191 = arith.constant 0 : index
    %308 = vector.load %arg7[%c0_190, %c0_191] : memref<1x128xf32, #tpu.memory_space<vmem>>, vector<1x128xf32>
    %309 = vector.broadcast %308 : vector<1x128xf32> to vector<8x128xf32>
    %310 = arith.addf %307, %309 : vector<8x128xf32>
    %c0_192 = arith.constant 0 : index
    %c0_193 = arith.constant 0 : index
    %311 = vector.load %arg14[%c0_192, %c0_193] : memref<8x32xf32, #tpu.memory_space<vmem>>, vector<8x32xf32>
    %c0_194 = arith.constant 0 : index
    %c0_195 = arith.constant 0 : index
    %312 = vector.load %arg6[%c0_194, %c0_195] : memref<32x128xf32, #tpu.memory_space<vmem>>, vector<32x128xf32>
    %cst_196 = arith.constant dense<0.000000e+00> : vector<8x128xf32>
    %313 = tpu.matmul %311, %312, %cst_196 {dimension_numbers = #tpu.dot_dimension_numbers<[1], [0], [0], [1], [0, 0, 1, 1], [], []>} : vector<8x32xf32>, vector<32x128xf32>, vector<8x128xf32> -> vector<8x128xf32>
    %314 = arith.addf %310, %313 : vector<8x128xf32>
    %315 = arith.negf %314 : vector<8x128xf32>
    %316 = math.exp %315 : vector<8x128xf32>
    %cst_197 = arith.constant 1.000000e+00 : f32
    %317 = vector.broadcast %cst_197 : f32 to vector<8x128xf32>
    %318 = arith.addf %317, %316 : vector<8x128xf32>
    %319 = arith.divf %317, %318 : vector<8x128xf32>
    %320 = math.tanh %314 : vector<8x128xf32>
    %321 = vector.extract_strided_slice %319 {offsets = [0, 0], sizes = [8, 32], strides = [1, 1]} : vector<8x128xf32> to vector<8x32xf32>
    %322 = vector.extract_strided_slice %319 {offsets = [0, 32], sizes = [8, 32], strides = [1, 1]} : vector<8x128xf32> to vector<8x32xf32>
    %323 = vector.extract_strided_slice %319 {offsets = [0, 96], sizes = [8, 32], strides = [1, 1]} : vector<8x128xf32> to vector<8x32xf32>
    %324 = vector.extract_strided_slice %320 {offsets = [0, 64], sizes = [8, 32], strides = [1, 1]} : vector<8x128xf32> to vector<8x32xf32>
    %c0_198 = arith.constant 0 : index
    %c0_199 = arith.constant 0 : index
    %325 = vector.load %arg15[%c0_198, %c0_199] : memref<8x32xf32, #tpu.memory_space<vmem>>, vector<8x32xf32>
    %326 = arith.mulf %322, %325 : vector<8x32xf32>
    %327 = arith.mulf %321, %324 : vector<8x32xf32>
    %328 = arith.addf %326, %327 : vector<8x32xf32>
    %329 = math.tanh %328 : vector<8x32xf32>
    %330 = arith.mulf %323, %329 : vector<8x32xf32>
    %c0_200 = arith.constant 0 : index
    %c0_201 = arith.constant 0 : index
    %331 = vector.load %arg15[%c0_200, %c0_201] : memref<8x32xf32, #tpu.memory_space<vmem>>, vector<8x32xf32>
    tpu.vector_store %arg15[%c0_200, %c0_201], %328 {strides = array<i32>} : memref<8x32xf32, #tpu.memory_space<vmem>>, vector<8x32xf32>,
    %c0_202 = arith.constant 0 : index
    %c0_203 = arith.constant 0 : index
    %332 = vector.load %arg14[%c0_202, %c0_203] : memref<8x32xf32, #tpu.memory_space<vmem>>, vector<8x32xf32>
    tpu.vector_store %arg14[%c0_202, %c0_203], %330 {strides = array<i32>} : memref<8x32xf32, #tpu.memory_space<vmem>>, vector<8x32xf32>,
    %c6_i32 = arith.constant 6 : i32
    %c8_i32_204 = arith.constant 8 : i32
    %333 = arith.muli %c6_i32, %c8_i32_204 : i32
    %334 = tpu.assume_multiple %333, 8 : i32
    %335 = arith.index_cast %334 : i32 to index
    %c0_205 = arith.constant 0 : index
    %336 = vector.load %arg11[%335, %c0_205] : memref<64x128xf32, #tpu.memory_space<vmem>>, vector<8x128xf32>
    %c0_206 = arith.constant 0 : index
    %c0_207 = arith.constant 0 : index
    %337 = vector.load %arg12[%c0_206, %c0_207] : memref<8x32xf32, #tpu.memory_space<vmem>>, vector<8x32xf32>
    %c0_208 = arith.constant 0 : index
    %c0_209 = arith.constant 0 : index
    %338 = vector.load %arg3[%c0_208, %c0_209] : memref<32x128xf32, #tpu.memory_space<vmem>>, vector<32x128xf32>
    %cst_210 = arith.constant dense<0.000000e+00> : vector<8x128xf32>
    %339 = tpu.matmul %337, %338, %cst_210 {dimension_numbers = #tpu.dot_dimension_numbers<[1], [0], [0], [1], [0, 0, 1, 1], [], []>} : vector<8x32xf32>, vector<32x128xf32>, vector<8x128xf32> -> vector<8x128xf32>
    %340 = arith.addf %336, %339 : vector<8x128xf32>
    %341 = arith.negf %340 : vector<8x128xf32>
    %342 = math.exp %341 : vector<8x128xf32>
    %cst_211 = arith.constant 1.000000e+00 : f32
    %343 = vector.broadcast %cst_211 : f32 to vector<8x128xf32>
    %344 = arith.addf %343, %342 : vector<8x128xf32>
    %345 = arith.divf %343, %344 : vector<8x128xf32>
    %346 = math.tanh %340 : vector<8x128xf32>
    %347 = vector.extract_strided_slice %345 {offsets = [0, 0], sizes = [8, 32], strides = [1, 1]} : vector<8x128xf32> to vector<8x32xf32>
    %348 = vector.extract_strided_slice %345 {offsets = [0, 32], sizes = [8, 32], strides = [1, 1]} : vector<8x128xf32> to vector<8x32xf32>
    %349 = vector.extract_strided_slice %345 {offsets = [0, 96], sizes = [8, 32], strides = [1, 1]} : vector<8x128xf32> to vector<8x32xf32>
    %350 = vector.extract_strided_slice %346 {offsets = [0, 64], sizes = [8, 32], strides = [1, 1]} : vector<8x128xf32> to vector<8x32xf32>
    %c0_212 = arith.constant 0 : index
    %c0_213 = arith.constant 0 : index
    %351 = vector.load %arg13[%c0_212, %c0_213] : memref<8x32xf32, #tpu.memory_space<vmem>>, vector<8x32xf32>
    %352 = arith.mulf %348, %351 : vector<8x32xf32>
    %353 = arith.mulf %347, %350 : vector<8x32xf32>
    %354 = arith.addf %352, %353 : vector<8x32xf32>
    %355 = math.tanh %354 : vector<8x32xf32>
    %356 = arith.mulf %349, %355 : vector<8x32xf32>
    %c0_214 = arith.constant 0 : index
    %c0_215 = arith.constant 0 : index
    %357 = vector.load %arg13[%c0_214, %c0_215] : memref<8x32xf32, #tpu.memory_space<vmem>>, vector<8x32xf32>
    tpu.vector_store %arg13[%c0_214, %c0_215], %354 {strides = array<i32>} : memref<8x32xf32, #tpu.memory_space<vmem>>, vector<8x32xf32>,
    %c0_216 = arith.constant 0 : index
    %c0_217 = arith.constant 0 : index
    %358 = vector.load %arg12[%c0_216, %c0_217] : memref<8x32xf32, #tpu.memory_space<vmem>>, vector<8x32xf32>
    tpu.vector_store %arg12[%c0_216, %c0_217], %356 {strides = array<i32>} : memref<8x32xf32, #tpu.memory_space<vmem>>, vector<8x32xf32>,
    %c0_218 = arith.constant 0 : index
    %c0_219 = arith.constant 0 : index
    %359 = vector.load %arg5[%c0_218, %c0_219] : memref<32x128xf32, #tpu.memory_space<vmem>>, vector<32x128xf32>
    %cst_220 = arith.constant dense<0.000000e+00> : vector<8x128xf32>
    %360 = tpu.matmul %356, %359, %cst_220 {dimension_numbers = #tpu.dot_dimension_numbers<[1], [0], [0], [1], [0, 0, 1, 1], [], []>} : vector<8x32xf32>, vector<32x128xf32>, vector<8x128xf32> -> vector<8x128xf32>
    %c0_221 = arith.constant 0 : index
    %c0_222 = arith.constant 0 : index
    %361 = vector.load %arg7[%c0_221, %c0_222] : memref<1x128xf32, #tpu.memory_space<vmem>>, vector<1x128xf32>
    %362 = vector.broadcast %361 : vector<1x128xf32> to vector<8x128xf32>
    %363 = arith.addf %360, %362 : vector<8x128xf32>
    %c0_223 = arith.constant 0 : index
    %c0_224 = arith.constant 0 : index
    %364 = vector.load %arg14[%c0_223, %c0_224] : memref<8x32xf32, #tpu.memory_space<vmem>>, vector<8x32xf32>
    %c0_225 = arith.constant 0 : index
    %c0_226 = arith.constant 0 : index
    %365 = vector.load %arg6[%c0_225, %c0_226] : memref<32x128xf32, #tpu.memory_space<vmem>>, vector<32x128xf32>
    %cst_227 = arith.constant dense<0.000000e+00> : vector<8x128xf32>
    %366 = tpu.matmul %364, %365, %cst_227 {dimension_numbers = #tpu.dot_dimension_numbers<[1], [0], [0], [1], [0, 0, 1, 1], [], []>} : vector<8x32xf32>, vector<32x128xf32>, vector<8x128xf32> -> vector<8x128xf32>
    %367 = arith.addf %363, %366 : vector<8x128xf32>
    %368 = arith.negf %367 : vector<8x128xf32>
    %369 = math.exp %368 : vector<8x128xf32>
    %cst_228 = arith.constant 1.000000e+00 : f32
    %370 = vector.broadcast %cst_228 : f32 to vector<8x128xf32>
    %371 = arith.addf %370, %369 : vector<8x128xf32>
    %372 = arith.divf %370, %371 : vector<8x128xf32>
    %373 = math.tanh %367 : vector<8x128xf32>
    %374 = vector.extract_strided_slice %372 {offsets = [0, 0], sizes = [8, 32], strides = [1, 1]} : vector<8x128xf32> to vector<8x32xf32>
    %375 = vector.extract_strided_slice %372 {offsets = [0, 32], sizes = [8, 32], strides = [1, 1]} : vector<8x128xf32> to vector<8x32xf32>
    %376 = vector.extract_strided_slice %372 {offsets = [0, 96], sizes = [8, 32], strides = [1, 1]} : vector<8x128xf32> to vector<8x32xf32>
    %377 = vector.extract_strided_slice %373 {offsets = [0, 64], sizes = [8, 32], strides = [1, 1]} : vector<8x128xf32> to vector<8x32xf32>
    %c0_229 = arith.constant 0 : index
    %c0_230 = arith.constant 0 : index
    %378 = vector.load %arg15[%c0_229, %c0_230] : memref<8x32xf32, #tpu.memory_space<vmem>>, vector<8x32xf32>
    %379 = arith.mulf %375, %378 : vector<8x32xf32>
    %380 = arith.mulf %374, %377 : vector<8x32xf32>
    %381 = arith.addf %379, %380 : vector<8x32xf32>
    %382 = math.tanh %381 : vector<8x32xf32>
    %383 = arith.mulf %376, %382 : vector<8x32xf32>
    %c0_231 = arith.constant 0 : index
    %c0_232 = arith.constant 0 : index
    %384 = vector.load %arg15[%c0_231, %c0_232] : memref<8x32xf32, #tpu.memory_space<vmem>>, vector<8x32xf32>
    tpu.vector_store %arg15[%c0_231, %c0_232], %381 {strides = array<i32>} : memref<8x32xf32, #tpu.memory_space<vmem>>, vector<8x32xf32>,
    %c0_233 = arith.constant 0 : index
    %c0_234 = arith.constant 0 : index
    %385 = vector.load %arg14[%c0_233, %c0_234] : memref<8x32xf32, #tpu.memory_space<vmem>>, vector<8x32xf32>
    tpu.vector_store %arg14[%c0_233, %c0_234], %383 {strides = array<i32>} : memref<8x32xf32, #tpu.memory_space<vmem>>, vector<8x32xf32>,
    %c7_i32 = arith.constant 7 : i32
    %c8_i32_235 = arith.constant 8 : i32
    %386 = arith.muli %c7_i32, %c8_i32_235 : i32
    %387 = tpu.assume_multiple %386, 8 : i32
    %388 = arith.index_cast %387 : i32 to index
    %c0_236 = arith.constant 0 : index
    %389 = vector.load %arg11[%388, %c0_236] : memref<64x128xf32, #tpu.memory_space<vmem>>, vector<8x128xf32>
    %c0_237 = arith.constant 0 : index
    %c0_238 = arith.constant 0 : index
    %390 = vector.load %arg12[%c0_237, %c0_238] : memref<8x32xf32, #tpu.memory_space<vmem>>, vector<8x32xf32>
    %c0_239 = arith.constant 0 : index
    %c0_240 = arith.constant 0 : index
    %391 = vector.load %arg3[%c0_239, %c0_240] : memref<32x128xf32, #tpu.memory_space<vmem>>, vector<32x128xf32>
    %cst_241 = arith.constant dense<0.000000e+00> : vector<8x128xf32>
    %392 = tpu.matmul %390, %391, %cst_241 {dimension_numbers = #tpu.dot_dimension_numbers<[1], [0], [0], [1], [0, 0, 1, 1], [], []>} : vector<8x32xf32>, vector<32x128xf32>, vector<8x128xf32> -> vector<8x128xf32>
    %393 = arith.addf %389, %392 : vector<8x128xf32>
    %394 = arith.negf %393 : vector<8x128xf32>
    %395 = math.exp %394 : vector<8x128xf32>
    %cst_242 = arith.constant 1.000000e+00 : f32
    %396 = vector.broadcast %cst_242 : f32 to vector<8x128xf32>
    %397 = arith.addf %396, %395 : vector<8x128xf32>
    %398 = arith.divf %396, %397 : vector<8x128xf32>
    %399 = math.tanh %393 : vector<8x128xf32>
    %400 = vector.extract_strided_slice %398 {offsets = [0, 0], sizes = [8, 32], strides = [1, 1]} : vector<8x128xf32> to vector<8x32xf32>
    %401 = vector.extract_strided_slice %398 {offsets = [0, 32], sizes = [8, 32], strides = [1, 1]} : vector<8x128xf32> to vector<8x32xf32>
    %402 = vector.extract_strided_slice %398 {offsets = [0, 96], sizes = [8, 32], strides = [1, 1]} : vector<8x128xf32> to vector<8x32xf32>
    %403 = vector.extract_strided_slice %399 {offsets = [0, 64], sizes = [8, 32], strides = [1, 1]} : vector<8x128xf32> to vector<8x32xf32>
    %c0_243 = arith.constant 0 : index
    %c0_244 = arith.constant 0 : index
    %404 = vector.load %arg13[%c0_243, %c0_244] : memref<8x32xf32, #tpu.memory_space<vmem>>, vector<8x32xf32>
    %405 = arith.mulf %401, %404 : vector<8x32xf32>
    %406 = arith.mulf %400, %403 : vector<8x32xf32>
    %407 = arith.addf %405, %406 : vector<8x32xf32>
    %408 = math.tanh %407 : vector<8x32xf32>
    %409 = arith.mulf %402, %408 : vector<8x32xf32>
    %c0_245 = arith.constant 0 : index
    %c0_246 = arith.constant 0 : index
    %410 = vector.load %arg13[%c0_245, %c0_246] : memref<8x32xf32, #tpu.memory_space<vmem>>, vector<8x32xf32>
    tpu.vector_store %arg13[%c0_245, %c0_246], %407 {strides = array<i32>} : memref<8x32xf32, #tpu.memory_space<vmem>>, vector<8x32xf32>,
    %c0_247 = arith.constant 0 : index
    %c0_248 = arith.constant 0 : index
    %411 = vector.load %arg12[%c0_247, %c0_248] : memref<8x32xf32, #tpu.memory_space<vmem>>, vector<8x32xf32>
    tpu.vector_store %arg12[%c0_247, %c0_248], %409 {strides = array<i32>} : memref<8x32xf32, #tpu.memory_space<vmem>>, vector<8x32xf32>,
    %c0_249 = arith.constant 0 : index
    %c0_250 = arith.constant 0 : index
    %412 = vector.load %arg5[%c0_249, %c0_250] : memref<32x128xf32, #tpu.memory_space<vmem>>, vector<32x128xf32>
    %cst_251 = arith.constant dense<0.000000e+00> : vector<8x128xf32>
    %413 = tpu.matmul %409, %412, %cst_251 {dimension_numbers = #tpu.dot_dimension_numbers<[1], [0], [0], [1], [0, 0, 1, 1], [], []>} : vector<8x32xf32>, vector<32x128xf32>, vector<8x128xf32> -> vector<8x128xf32>
    %c0_252 = arith.constant 0 : index
    %c0_253 = arith.constant 0 : index
    %414 = vector.load %arg7[%c0_252, %c0_253] : memref<1x128xf32, #tpu.memory_space<vmem>>, vector<1x128xf32>
    %415 = vector.broadcast %414 : vector<1x128xf32> to vector<8x128xf32>
    %416 = arith.addf %413, %415 : vector<8x128xf32>
    %c0_254 = arith.constant 0 : index
    %c0_255 = arith.constant 0 : index
    %417 = vector.load %arg14[%c0_254, %c0_255] : memref<8x32xf32, #tpu.memory_space<vmem>>, vector<8x32xf32>
    %c0_256 = arith.constant 0 : index
    %c0_257 = arith.constant 0 : index
    %418 = vector.load %arg6[%c0_256, %c0_257] : memref<32x128xf32, #tpu.memory_space<vmem>>, vector<32x128xf32>
    %cst_258 = arith.constant dense<0.000000e+00> : vector<8x128xf32>
    %419 = tpu.matmul %417, %418, %cst_258 {dimension_numbers = #tpu.dot_dimension_numbers<[1], [0], [0], [1], [0, 0, 1, 1], [], []>} : vector<8x32xf32>, vector<32x128xf32>, vector<8x128xf32> -> vector<8x128xf32>
    %420 = arith.addf %416, %419 : vector<8x128xf32>
    %421 = arith.negf %420 : vector<8x128xf32>
    %422 = math.exp %421 : vector<8x128xf32>
    %cst_259 = arith.constant 1.000000e+00 : f32
    %423 = vector.broadcast %cst_259 : f32 to vector<8x128xf32>
    %424 = arith.addf %423, %422 : vector<8x128xf32>
    %425 = arith.divf %423, %424 : vector<8x128xf32>
    %426 = math.tanh %420 : vector<8x128xf32>
    %427 = vector.extract_strided_slice %425 {offsets = [0, 0], sizes = [8, 32], strides = [1, 1]} : vector<8x128xf32> to vector<8x32xf32>
    %428 = vector.extract_strided_slice %425 {offsets = [0, 32], sizes = [8, 32], strides = [1, 1]} : vector<8x128xf32> to vector<8x32xf32>
    %429 = vector.extract_strided_slice %425 {offsets = [0, 96], sizes = [8, 32], strides = [1, 1]} : vector<8x128xf32> to vector<8x32xf32>
    %430 = vector.extract_strided_slice %426 {offsets = [0, 64], sizes = [8, 32], strides = [1, 1]} : vector<8x128xf32> to vector<8x32xf32>
    %c0_260 = arith.constant 0 : index
    %c0_261 = arith.constant 0 : index
    %431 = vector.load %arg15[%c0_260, %c0_261] : memref<8x32xf32, #tpu.memory_space<vmem>>, vector<8x32xf32>
    %432 = arith.mulf %428, %431 : vector<8x32xf32>
    %433 = arith.mulf %427, %430 : vector<8x32xf32>
    %434 = arith.addf %432, %433 : vector<8x32xf32>
    %435 = math.tanh %434 : vector<8x32xf32>
    %436 = arith.mulf %429, %435 : vector<8x32xf32>
    %c0_262 = arith.constant 0 : index
    %c0_263 = arith.constant 0 : index
    %437 = vector.load %arg15[%c0_262, %c0_263] : memref<8x32xf32, #tpu.memory_space<vmem>>, vector<8x32xf32>
    tpu.vector_store %arg15[%c0_262, %c0_263], %434 {strides = array<i32>} : memref<8x32xf32, #tpu.memory_space<vmem>>, vector<8x32xf32>,
    %c0_264 = arith.constant 0 : index
    %c0_265 = arith.constant 0 : index
    %438 = vector.load %arg14[%c0_264, %c0_265] : memref<8x32xf32, #tpu.memory_space<vmem>>, vector<8x32xf32>
    tpu.vector_store %arg14[%c0_264, %c0_265], %436 {strides = array<i32>} : memref<8x32xf32, #tpu.memory_space<vmem>>, vector<8x32xf32>,
    %c8_i32_266 = arith.constant 8 : i32
    %c0_267 = arith.constant 0 : index
    %c0_268 = arith.constant 0 : index
    %439 = vector.load %arg14[%c0_267, %c0_268] : memref<8x32xf32, #tpu.memory_space<vmem>>, vector<8x32xf32>
    %c0_269 = arith.constant 0 : index
    %c0_270 = arith.constant 0 : index
    %440 = vector.load %arg8[%c0_269, %c0_270] : memref<32x128xf32, #tpu.memory_space<vmem>>, vector<32x128xf32>
    %cst_271 = arith.constant dense<0.000000e+00> : vector<8x128xf32>
    %441 = tpu.matmul %439, %440, %cst_271 {dimension_numbers = #tpu.dot_dimension_numbers<[1], [0], [0], [1], [0, 0, 1, 1], [], []>} : vector<8x32xf32>, vector<32x128xf32>, vector<8x128xf32> -> vector<8x128xf32>
    %c0_272 = arith.constant 0 : index
    %c0_273 = arith.constant 0 : index
    %442 = vector.load %arg9[%c0_272, %c0_273] : memref<1x128xf32, #tpu.memory_space<vmem>>, vector<1x128xf32>
    %443 = vector.broadcast %442 : vector<1x128xf32> to vector<8x128xf32>
    %444 = arith.addf %441, %443 : vector<8x128xf32>
    %c0_274 = arith.constant 0 : index
    %c0_275 = arith.constant 0 : index
    %445 = vector.load %arg10[%c0_274, %c0_275] : memref<8x128xf32, #tpu.memory_space<vmem>>, vector<8x128xf32>
    tpu.vector_store %arg10[%c0_274, %c0_275], %444 {strides = array<i32>} : memref<8x128xf32, #tpu.memory_space<vmem>>, vector<8x128xf32>,
    return
  }
  func.func @transform_0(%arg0: i32) -> (i32, i32) {
    %c0_i32 = arith.constant 0 : i32
    %c0_i32_0 = arith.constant 0 : i32
    %c0_i32_1 = arith.constant 0 : i32
    return %c0_i32, %c0_i32_0 : i32, i32
  }
  func.func @transform_1(%arg0: i32) -> (i32, i32) {
    %c0_i32 = arith.constant 0 : i32
    %c0_i32_0 = arith.constant 0 : i32
    %c0_i32_1 = arith.constant 0 : i32
    return %c0_i32, %c0_i32_0 : i32, i32
  }
  func.func @transform_2(%arg0: i32) -> (i32, i32) {
    %c0_i32 = arith.constant 0 : i32
    %c0_i32_0 = arith.constant 0 : i32
    %c0_i32_1 = arith.constant 0 : i32
    return %c0_i32, %c0_i32_0 : i32, i32
  }
  func.func @transform_3(%arg0: i32) -> (i32, i32) {
    %c0_i32 = arith.constant 0 : i32
    %c0_i32_0 = arith.constant 0 : i32
    %c0_i32_1 = arith.constant 0 : i32
    return %c0_i32, %c0_i32_0 : i32, i32
  }
  func.func @transform_4(%arg0: i32) -> (i32, i32) {
    %c0_i32 = arith.constant 0 : i32
    %c0_i32_0 = arith.constant 0 : i32
    %c0_i32_1 = arith.constant 0 : i32
    return %c0_i32, %c0_i32_0 : i32, i32
  }
  func.func @transform_5(%arg0: i32) -> (i32, i32) {
    %c0_i32 = arith.constant 0 : i32
    %c0_i32_0 = arith.constant 0 : i32
    %c0_i32_1 = arith.constant 0 : i32
    return %c0_i32, %c0_i32_0 : i32, i32
  }
  func.func @transform_6(%arg0: i32) -> (i32, i32) {
    %c0_i32 = arith.constant 0 : i32
    %c0_i32_0 = arith.constant 0 : i32
    %c0_i32_1 = arith.constant 0 : i32
    return %c0_i32, %c0_i32_0 : i32, i32
  }
  func.func @transform_7(%arg0: i32) -> (i32, i32) {
    %c0_i32 = arith.constant 0 : i32
    %c0_i32_0 = arith.constant 0 : i32
    %c0_i32_1 = arith.constant 0 : i32
    return %c0_i32, %c0_i32_0 : i32, i32
  }
  func.func @transform_8(%arg0: i32) -> (i32, i32) {
    %c0_i32 = arith.constant 0 : i32
    %c0_i32_0 = arith.constant 0 : i32
    %c0_i32_1 = arith.constant 0 : i32
    return %c0_i32, %c0_i32_0 : i32, i32
  }
  func.func @transform_9(%arg0: i32) -> (i32, i32) {
    %c0_i32 = arith.constant 0 : i32
    %c0_i32_0 = arith.constant 0 : i32
    %c0_i32_1 = arith.constant 0 : i32
    return %c0_i32, %c0_i32_0 : i32, i32
  }
}

</mosaic_0001>

<bundles_post_ra>
// kernel: tpu_custom_call.1
= control target key start
LH: loop header
LB: loop body
LE: loop exit
PB: predicated region body
PF: predicated region fallthrough
CT: control target
= control target key end

     0   :  { %14 = vsyncpa [#allocation8], 0  ;;  %s2492_s0 = inlined_call_operand.vmem [shape: f32[64,34], index: 0, kind: input, shape index: {}]   ;;  %s2493_s1 = inlined_call_operand.vmem [shape: f32[34,128], index: 1, kind: input, shape index: {}]   ;;  %s2494_s2 = inlined_call_operand.vmem [shape: f32[32,128], index: 2, kind: input, shape index: {}]   ;;  %s2495_s3 = inlined_call_operand.vmem [shape: f32[1,128], index: 3, kind: input, shape index: {}]   ;;  %s2496_s4 = inlined_call_operand.vmem [shape: f32[32,128], index: 4, kind: input, shape index: {}]   ;;  %s2497_s5 = inlined_call_operand.hbm [shape: f32[32,128], index: 5, kind: input, shape index: {}]   ;;  %s2498_s6 = inlined_call_operand.vmem [shape: f32[1,128], index: 6, kind: input, shape index: {}]   ;;  %s2499_s7 = inlined_call_operand.hbm [shape: f32[32,128], index: 7, kind: input, shape index: {}]   ;;  %s2500_s8 = inlined_call_operand.vmem [shape: f32[1,128], index: 8, kind: input, shape index: {}]   ;;  %s2501_s9 = inlined_call_operand.hbm [shape: f32[8,128], index: 9, kind: output, shape index: {}]  }
   0x1   :  { %15 = vsyncpa [#allocation11], 0 }
   0x2   :  { %16 = vsyncpa [#allocation9], 0  ;;  %s31_s11 = sshll.u32 %s2497_s5, 4  ;;  %s2043_s12 = smov [#allocation7]   ;;  %s32_s11 = int_to_ptr.hbm [resolvable:$true] %s31_s11 }
   0x3   :  { %s33_s13 = sshll.u32 %s2043_s12, 4  ;;  %s46_s16 = sshll.u32 %s2499_s7, 4  ;;  %s34_s13 = int_to_ptr.vmem [resolvable:$true] %s33_s13  ;;  %s47_s16 = int_to_ptr.hbm [resolvable:$true] %s46_s16 }
   0x4   :  { %s2044_s17 = smov 128   ;;  %s2045_s18 = smov 8  }
   0x5   :  { %39 = dma.hbm_to_vmem [thread:$0]  %s32_s11, 512, %s34_s13, [#allocation8], %s2044_s17, %s2044_s17, %s2045_s18  }
   0x6   :  { %s2046_s19 = smov [#allocation10]  }
   0x7   :  { %s48_s20 = sshll.u32 %s2046_s19, 4  ;;  %s49_s20 = int_to_ptr.vmem [resolvable:$true] %s48_s20 }
   0x8   :  { %54 = dma.hbm_to_vmem [thread:$0]  %s47_s16, 512, %s49_s20, [#allocation11], %s2044_s17, %s2044_s17, %s2045_s18  }
   0x9   :  { %2037 = dma.done.wait [#allocation8], 512  }
   0xa   :  { %2038 = vsyncadd [#allocation8], 4294966784 }
   0xb   :  { %2039 = dma.done.wait [#allocation11], 512  }
   0xc   :  { %2040 = vsyncadd [#allocation11], 4294966784  ;;  %vm65_vm0 = vcmask 261120   ;;  %v2047_v0 = vmov 0.0   ;;  %vm112_vm1 = vcmask 1041408   ;;  %v81_v2 = vld [vmem:[%s2493_s1 + $0x18] sm:$0xff] }
   0xd   :  { %66 = vst.msk [vmem:[#allocation3] sm:$0xff] %vm65_vm0, %v2047_v0  ;;  %v82_v1 = vld [vmem:[%s2493_s1 + $0x20] sm:$0x3]  ;;  %v2121_v3 = vld [vmem:[%s2494_s2 + $0x18] sm:$0xff]  ;;  %v2126_v4 = vld [vmem:[%s2494_s2 + $0x10] sm:$0xff]  ;;  %vm87_vm2 = vcmask 277504  }
   0xe   :  { %67 = vst.msk [vmem:[#allocation4] sm:$0xff] %vm65_vm0, %v2047_v0  ;;  %1767 = vmatpush.msk.msra.mxu0 %vm112_vm1, %v82_v1  ;;  %v80_v5 = vld [vmem:[%s2493_s1 + $0x10] sm:$0xff]  ;;  %186 = vmatpush.msra.mxu1 %v2121_v3  ;;  %v79_v6 = vld [vmem:[%s2493_s1 + $0x8] sm:$0xff]  ;;  %v2143_v8 = vld [vmem:[%s2494_s2] sm:$0xff]  ;;  %s2048_s19 = smov 64   ;;  %s2049_s20 = smov 32  }
   0xf   :  { %68 = vst.msk [vmem:[#allocation5] sm:$0xff] %vm65_vm0, %v2047_v0  ;;  %v2138_v7 = vld [vmem:[%s2494_s2 + $0x8] sm:$0xff]  ;;  %v78_v9 = vld [vmem:[%s2493_s1] sm:$0xff]  ;;  %v2177_v39 = vld [vmem:[%s2496_s4 + $0x18] sm:$0xff]  ;;  %s2050_s27 = smov 96   ;;  %s1756_s11 = sshll.u32 %s2501_s9, 4  ;;  %s1757_s11 = int_to_ptr.hbm [resolvable:$true] %s1756_s11 }
  0x10   :  { %69 = vst.msk [vmem:[#allocation6] sm:$0xff] %vm65_vm0, %v2047_v0  ;;  %128 = vmatpush.msra.mxu0 %v81_v2  ;;  %187 = vmatpush.msra.mxu1 %v2126_v4  ;;  %v70_v11 = vld [vmem:[%s2492_s0] sm:$0xff]  ;;  %v2182_v40 = vld [vmem:[%s2496_s4 + $0x10] sm:$0xff]  ;;  %v2184_v41 = vld [vmem:[#allocation7 + $0x18] sm:$0xff] }
  0x11   :  { %v2167_v12 = vld [vmem:[%s2495_s3] ss:$0 sm:$0xff]  ;;  %269 = vmatpush.msra.mxu2 %v2177_v39  ;;  %297 = vmatpush.msra.mxu3 %v2184_v41  ;;  %v2188_v42 = vld [vmem:[#allocation7 + $0x10] sm:$0xff]  ;;  %v2193_v43 = vld [vmem:[%s2496_s4 + $0x8] sm:$0xff] }
  0x12   :  { %129 = vmatpush.msra.mxu0 %v80_v5  ;;  %188 = vmatpush.msra.mxu1 %v2138_v7  ;;  %v2195_v44 = vld [vmem:[#allocation7 + $0x8] sm:$0xff]  ;;  %v2202_v45 = vld [vmem:[%s2496_s4] sm:$0xff] }
  0x13   :  { %270 = vmatpush.msra.mxu2 %v2182_v40  ;;  %298 = vmatpush.msra.mxu3 %v2188_v42  ;;  %v2213_v48 = vld [vmem:[#allocation7] sm:$0xff]  ;;  %v71_v50 = vld [vmem:[%s2492_s0 + $0x8] sm:$0xff] }
  0x14   :  { %v166_v10 = vld [vmem:[#allocation3] sm:$0xff]  ;;  %130 = vmatpush.msra.mxu0 %v79_v6  ;;  %189 = vmatpush.msra.mxu1 %v2143_v8 }
  0x15   :  { %1776 = vmatmul.msk.f32.vlgmr.msra.gmra.mxu1 %vm65_vm0, %v166_v10  ;;  %v215_v18 = vld [vmem:[#allocation4] sm:$0xff]  ;;  %271 = vmatpush.msra.mxu2 %v2193_v43  ;;  %v1827_v56 = vld [vmem:[%s2498_s6] ss:$0 sm:$0xff] }
  0x16   :  { %131 = vmatpush.msra.mxu0 %v78_v9  ;;  %380 = vmatpush.msrb.mxu1 %v2121_v3  ;;  %v277_v49 = vld [vmem:[#allocation5] sm:$0xff] }
  0x17   :  { %1768 = vmatmul.msk.f32.vlgmr.msra.gmra.mxu0 %vm87_vm2, %v70_v11  ;;  %299 = vmatpush.msra.mxu3 %v2195_v44  ;;  %v326_v51 = vld [vmem:[#allocation6] sm:$0xff] }
  0x18   :  { %381 = vmatpush.msrb.mxu1 %v2126_v4  ;;  %272 = vmatpush.msra.mxu2 %v2202_v45 }
  0x19   :  { %300 = vmatpush.msra.mxu3 %v2213_v48 }
  0x1a   :  { %382 = vmatpush.msrb.mxu1 %v2138_v7  ;;  %463 = vmatpush.msrb.mxu2 %v2177_v39 }
  0x1b   :  { %1779 = vmatmul.msk.f32.vlgmr.msra.gmra.mxu3 %vm65_vm0, %v277_v49 }
  0x1c   :  { %383 = vmatpush.msrb.mxu1 %v2143_v8  ;;  %464 = vmatpush.msrb.mxu2 %v2182_v40 }
  0x1d   :  { %491 = vmatpush.msrb.mxu3 %v2184_v41 }
  0x1e   :  { %574 = vmatpush.msra.mxu1 %v2121_v3  ;;  %465 = vmatpush.msrb.mxu2 %v2193_v43 }
  0x1f   :  { %1769 = vmatmul.msk.f32.gmra.mxu0 %vm87_vm2, %v71_v50  ;;  %492 = vmatpush.msrb.mxu3 %v2188_v42 }
  0x20   :  { %575 = vmatpush.msra.mxu1 %v2126_v4  ;;  %466 = vmatpush.msrb.mxu2 %v2202_v45 }
  0x21   :  { %493 = vmatpush.msrb.mxu3 %v2195_v44 }
  0x22   :  { %576 = vmatpush.msra.mxu1 %v2138_v7 }
  0x23   :  { %494 = vmatpush.msrb.mxu3 %v2213_v48 }
  0x24   :  { %577 = vmatpush.msra.mxu1 %v2143_v8 }
  0x25   :  { %685 = vmatpush.msra.mxu3 %v2184_v41 }
  0x27   :  { %686 = vmatpush.msra.mxu3 %v2188_v42 }
  0x29   :  { %687 = vmatpush.msra.mxu3 %v2195_v44 }
  0x2b   :  { %688 = vmatpush.msra.mxu3 %v2213_v48 }
  0x92   :  { %v191_v14 = vpop.f32.mrf.mxu1 }
  0x94   :  { %v133_v13 = vpop.f32.mrf.mxu0 }
  0x95   :  { %v134_v15 = vadd.f32 %v2167_v12, %v133_v13 }
  0x97   :  { %v194_v16 = vadd.f32 %v191_v14, %v134_v15 }
  0x99   :  { %1836 = vtanh.f32 %v194_v16  ;;  %v1777_v19 = vmul.f32 -1.442695, %v194_v16 }
  0x9b   :  { %1838 = vpow2.f32 %v1777_v19 }
  0x9c   :  { %v136_v55 = vpop.f32.mrf.mxu0 }
  0x9d   :  { %v137_v57 = vadd.f32 %v2167_v12, %v136_v55 }
  0x9e   :  { %v302_v59 = vpop.f32.mrf.mxu3 }
  0x9f   :  { %v1837_v17 = vpop.eup %1836 }
  0xa0   :  { %222 = vrot.lane.b32.xlu0 %v1837_v17, %s2048_s19 }
  0xa1   :  { %v1839_v20 = vpop.eup %1838 }
  0xa2   :  { %v198_v21 = vadd.f32 1.0, %v1839_v20 }
  0xa4   :  { %1840 = vrcp.f32 %v198_v21  ;;  %v210_v27 = vand.u32 2147483648, %v198_v21  ;;  %vm204_vm4 = vweird.f32 %v198_v21  ;;  %v208_v28 = vand.u32 2147483647, %v198_v21 }
  0xa6   :  { %v211_v30 = vor.u32 1.1754944e-38, %v210_v27  ;;  %vm209_vm6 = vcmp.eq.f32.partialorder %v208_v28, 8.507059e+37 }
  0xa8   :  { %217 = vrot.lane.b32.xlu0 %v215_v18, %s2049_s20 }
  0xaa   :  { %v1841_v22 = vpop.eup %1840 }
  0xab   :  { %v200_v23 = vmul.f32 %v1841_v22, %v198_v21  ;;  %vm205_vm3 = vweird.f32 %v1841_v22 }
  0xac   :  { %vm206_vm5 = vmor %vm204_vm4, %vm205_vm3 }
  0xad   :  { %v201_v24 = vsub.f32 1.0, %v200_v23 }
  0xaf   :  { %v202_v25 = vmul.f32 %v1841_v22, %v201_v24 }
  0xb1   :  { %v203_v26 = vadd.f32 %v1841_v22, %v202_v25 }
  0xb3   :  { %v207_v29 = vsel %vm206_vm5, %v1841_v22, %v203_v26 }
  0xb4   :  { %v212_v32 = vsel %vm209_vm6, %v211_v30, %v207_v29 }
 0x112   :  { %v223_v31 = vpop.permute.xlu0 %222 }
 0x113   :  { %v225_v33 = vmul.f32 %v223_v31, %v212_v32 }
 0x115   :  { %227 = vrot.lane.b32.xlu1 %v225_v33, %s2049_s20 }
 0x11a   :  { %v218_v34 = vpop.permute.xlu0 %217 }
 0x11b   :  { %v220_v35 = vmul.f32 %v218_v34, %v212_v32 }
 0x187   :  { %v228_v36 = vpop.permute.xlu1 %227 }
 0x188   :  { %v230_v37 = vadd.f32 %v228_v36, %v220_v35 }
 0x18a   :  { %1842 = vtanh.f32 %v230_v37 }
 0x190   :  { %v1843_v38 = vpop.eup %1842 }
 0x191   :  { %233 = vrot.lane.b32.xlu1 %v1843_v38, %s2048_s19 }
 0x203   :  { %v234_v46 = vpop.permute.xlu1 %233 }
 0x204   :  { %v236_v47 = vmul.f32 %v234_v46, %v212_v32 }
 0x206   :  { %243 = vrot.lane.b32.xlu2 %v236_v47, %s2049_s20 }
 0x20e   :  { %238 = vrot.lane.b32.xlu2 %v230_v37, %s2050_s27 }
 0x216   :  { %328 = vrot.lane.b32.xlu2 %v326_v51, %s2049_s20 }
 0x260   :  { %v244_v52 = vpop.permute.xlu2 %243 }
 0x261   :  { %246 = vst.msk [vmem:[#allocation3] sm:$0xff] %vm65_vm0, %v244_v52  ;;  %1778 = vmatmul.msk.f32.vlgmr.msra.gmra.mxu2 %vm65_vm0, %v244_v52 }
 0x262   :  { %657 = vmatpush.msra.mxu2 %v2177_v39 }
 0x264   :  { %658 = vmatpush.msra.mxu2 %v2182_v40 }
 0x266   :  { %659 = vmatpush.msra.mxu2 %v2193_v43 }
 0x268   :  { %v239_v53 = vpop.permute.xlu2 %238  ;;  %v360_v54 = vld [vmem:[#allocation3] sm:$0xff]  ;;  %660 = vmatpush.msra.mxu2 %v2202_v45 }
 0x269   :  { %241 = vst.msk [vmem:[#allocation4] sm:$0xff] %vm65_vm0, %v239_v53  ;;  %1781 = vmatmul.msk.f32.vlgmr.msrb.gmra.mxu1 %vm65_vm0, %v360_v54 }
 0x26a   :  { %768 = vmatpush.msrb.mxu1 %v2121_v3 }
 0x26c   :  { %769 = vmatpush.msrb.mxu1 %v2126_v4 }
 0x26e   :  { %770 = vmatpush.msrb.mxu1 %v2138_v7 }
 0x270   :  { %771 = vmatpush.msrb.mxu1 %v2143_v8  ;;  %v409_v2 = vld [vmem:[#allocation4] sm:$0xff]  ;;  %v329_v38 = vpop.permute.xlu2 %328 }
 0x2e4   :  { %v274_v58 = vpop.f32.mrf.mxu2 }
 0x2e5   :  { %v275_v60 = vadd.f32 %v1827_v56, %v274_v58 }
 0x2e6   :  { %v385_v61 = vpop.f32.mrf.mxu1 }
 0x2e7   :  { %v305_v62 = vadd.f32 %v302_v59, %v275_v60  ;;  %v388_v63 = vadd.f32 %v385_v61, %v137_v57 }
 0x2e9   :  { %1844 = vtanh.f32 %v305_v62  ;;  %v1780_v5 = vmul.f32 -1.442695, %v305_v62  ;;  %v1782_v6 = vmul.f32 -1.442695, %v388_v63  ;;  %v72_v62 = vld [vmem:[%s2492_s0 + $0x10] sm:$0xff] }
 0x2ea   :  { %1846 = vtanh.f32 %v388_v63  ;;  %1770 = vmatmul.msk.f32.gmra.mxu0 %vm87_vm2, %v72_v62 }
 0x2eb   :  { %1848 = vpow2.f32 %v1780_v5 }
 0x2ec   :  { %1850 = vpow2.f32 %v1782_v6 }
 0x2ef   :  { %v1845_v0 = vpop.eup %1844 }
 0x2f0   :  { %v1847_v1 = vpop.eup %1846  ;;  %333 = vrot.lane.b32.xlu0 %v1845_v0, %s2048_s19 }
 0x2f1   :  { %416 = vrot.lane.b32.xlu1 %v1847_v1, %s2048_s19  ;;  %v1849_v9 = vpop.eup %1848 }
 0x2f2   :  { %v1851_v10 = vpop.eup %1850  ;;  %v309_v11 = vadd.f32 1.0, %v1849_v9 }
 0x2f3   :  { %v392_v13 = vadd.f32 1.0, %v1851_v10  ;;  %v1828_v10 = vld [vmem:[%s2498_s6] ss:$0 sm:$0xff] }
 0x2f4   :  { %1852 = vrcp.f32 %v309_v11  ;;  %v321_v23 = vand.u32 2147483648, %v309_v11  ;;  %vm315_vm9 = vweird.f32 %v309_v11  ;;  %v319_v25 = vand.u32 2147483647, %v309_v11 }
 0x2f5   :  { %1854 = vrcp.f32 %v392_v13  ;;  %v404_v26 = vand.u32 2147483648, %v392_v13  ;;  %vm398_vm11 = vweird.f32 %v392_v13  ;;  %v402_v27 = vand.u32 2147483647, %v392_v13 }
 0x2f6   :  { %v322_v29 = vor.u32 1.1754944e-38, %v321_v23  ;;  %vm320_vm13 = vcmp.eq.f32.partialorder %v319_v25, 8.507059e+37 }
 0x2f7   :  { %v405_v31 = vor.u32 1.1754944e-38, %v404_v26  ;;  %vm403_vm14 = vcmp.eq.f32.partialorder %v402_v27, 8.507059e+37 }
 0x2f9   :  { %411 = vrot.lane.b32.xlu1 %v409_v2, %s2049_s20 }
 0x2fa   :  { %v1853_v14 = vpop.eup %1852 }
 0x2fb   :  { %v1855_v15 = vpop.eup %1854  ;;  %v311_v16 = vmul.f32 %v1853_v14, %v309_v11  ;;  %vm316_vm7 = vweird.f32 %v1853_v14 }
 0x2fc   :  { %v394_v17 = vmul.f32 %v1855_v15, %v392_v13  ;;  %vm399_vm8 = vweird.f32 %v1855_v15  ;;  %vm317_vm10 = vmor %vm315_vm9, %vm316_vm7 }
 0x2fd   :  { %v312_v18 = vsub.f32 1.0, %v311_v16  ;;  %vm400_vm12 = vmor %vm398_vm11, %vm399_vm8 }
 0x2fe   :  { %v395_v19 = vsub.f32 1.0, %v394_v17 }
 0x2ff   :  { %v313_v20 = vmul.f32 %v1853_v14, %v312_v18 }
 0x300   :  { %v396_v21 = vmul.f32 %v1855_v15, %v395_v19 }
 0x301   :  { %v314_v22 = vadd.f32 %v1853_v14, %v313_v20 }
 0x302   :  { %v397_v24 = vadd.f32 %v1855_v15, %v396_v21 }
 0x303   :  { %v318_v28 = vsel %vm317_vm10, %v1853_v14, %v314_v22 }
 0x304   :  { %v401_v30 = vsel %vm400_vm12, %v1855_v15, %v397_v24  ;;  %v323_v32 = vsel %vm320_vm13, %v322_v29, %v318_v28 }
 0x305   :  { %v406_v36 = vsel %vm403_vm14, %v405_v31, %v401_v30  ;;  %v331_v52 = vmul.f32 %v329_v38, %v323_v32 }
 0x362   :  { %v334_v33 = vpop.permute.xlu0 %333 }
 0x363   :  { %v336_v34 = vmul.f32 %v334_v33, %v323_v32  ;;  %v417_v35 = vpop.permute.xlu1 %416 }
 0x364   :  { %v419_v37 = vmul.f32 %v417_v35, %v406_v36 }
 0x365   :  { %338 = vrot.lane.b32.xlu0 %v336_v34, %s2049_s20 }
 0x366   :  { %421 = vrot.lane.b32.xlu2 %v419_v37, %s2049_s20 }
 0x367   :  { %v139_v6 = vpop.f32.mrf.mxu0 }
 0x368   :  { %v140_v9 = vadd.f32 %v2167_v12, %v139_v6 }
 0x36b   :  { %v412_v46 = vpop.permute.xlu1 %411 }
 0x36c   :  { %v414_v47 = vmul.f32 %v412_v46, %v406_v36 }
 0x3c0   :  { %v422_v49 = vpop.permute.xlu2 %421 }
 0x3c1   :  { %v424_v50 = vadd.f32 %v422_v49, %v414_v47 }
 0x3c3   :  { %1856 = vtanh.f32 %v424_v50 }
 0x3c9   :  { %v1857_v51 = vpop.eup %1856 }
 0x3ca   :  { %427 = vrot.lane.b32.xlu1 %v1857_v51, %s2048_s19 }
 0x3d7   :  { %v339_v53 = vpop.permute.xlu0 %338 }
 0x3d8   :  { %v341_v54 = vadd.f32 %v339_v53, %v331_v52 }
 0x3da   :  { %1858 = vtanh.f32 %v341_v54  ;;  %349 = vrot.lane.b32.xlu1 %v341_v54, %s2050_s27 }
 0x3e0   :  { %v1859_v55 = vpop.eup %1858 }
 0x3e1   :  { %344 = vrot.lane.b32.xlu0 %v1859_v55, %s2048_s19 }
 0x43c   :  { %v428_v56 = vpop.permute.xlu1 %427 }
 0x43d   :  { %v430_v57 = vmul.f32 %v428_v56, %v406_v36 }
 0x43f   :  { %437 = vrot.lane.b32.xlu0 %v430_v57, %s2049_s20 }
 0x44c   :  { %v350_v58 = vpop.permute.xlu1 %349 }
 0x44d   :  { %352 = vst.msk [vmem:[#allocation6] sm:$0xff] %vm65_vm0, %v350_v58 }
 0x453   :  { %v345_v59 = vpop.permute.xlu0 %344 }
 0x454   :  { %v347_v60 = vmul.f32 %v345_v59, %v323_v32  ;;  %v520_v61 = vld [vmem:[#allocation6] sm:$0xff] }
 0x456   :  { %354 = vrot.lane.b32.xlu2 %v347_v60, %s2049_s20 }
 0x45e   :  { %432 = vrot.lane.b32.xlu2 %v424_v50, %s2050_s27 }
 0x466   :  { %522 = vrot.lane.b32.xlu2 %v520_v61, %s2049_s20 }
 0x4b0   :  { %v355_v63 = vpop.permute.xlu2 %354 }
 0x4b1   :  { %v438_v0 = vpop.permute.xlu0 %437  ;;  %357 = vst.msk [vmem:[#allocation5] sm:$0xff] %vm65_vm0, %v355_v63 }
 0x4b2   :  { %440 = vst.msk [vmem:[#allocation3] sm:$0xff] %vm65_vm0, %v438_v0  ;;  %1783 = vmatmul.msk.f32.vlgmr.msrb.gmra.mxu2 %vm65_vm0, %v438_v0 }
 0x4b3   :  { %851 = vmatpush.msrb.mxu2 %v2177_v39 }
 0x4b5   :  { %852 = vmatpush.msrb.mxu2 %v2182_v40 }
 0x4b7   :  { %853 = vmatpush.msrb.mxu2 %v2193_v43 }
 0x4b8   :  { %v433_v1 = vpop.permute.xlu2 %432  ;;  %v471_v2 = vld [vmem:[#allocation5] sm:$0xff] }
 0x4b9   :  { %435 = vst.msk [vmem:[#allocation4] sm:$0xff] %vm65_vm0, %v433_v1  ;;  %1784 = vmatmul.msk.f32.vlgmr.msrb.gmra.mxu3 %vm65_vm0, %v471_v2  ;;  %v554_v5 = vld [vmem:[#allocation3] sm:$0xff]  ;;  %854 = vmatpush.msrb.mxu2 %v2202_v45 }
 0x4ba   :  { %1786 = vmatmul.msk.f32.vlgmr.msra.gmra.mxu1 %vm65_vm0, %v554_v5  ;;  %879 = vmatpush.msrb.mxu3 %v2184_v41 }
 0x4bb   :  { %962 = vmatpush.msra.mxu1 %v2121_v3 }
 0x4bc   :  { %880 = vmatpush.msrb.mxu3 %v2188_v42 }
 0x4bd   :  { %963 = vmatpush.msra.mxu1 %v2126_v4 }
 0x4be   :  { %881 = vmatpush.msrb.mxu3 %v2195_v44 }
 0x4bf   :  { %964 = vmatpush.msra.mxu1 %v2138_v7 }
 0x4c0   :  { %882 = vmatpush.msrb.mxu3 %v2213_v48  ;;  %v523_v55 = vpop.permute.xlu2 %522 }
 0x4c1   :  { %965 = vmatpush.msra.mxu1 %v2143_v8  ;;  %v603_v8 = vld [vmem:[#allocation4] sm:$0xff] }
 0x535   :  { %v468_v11 = vpop.f32.mrf.mxu2 }
 0x536   :  { %v469_v4 = vadd.f32 %v1828_v10, %v468_v11 }
 0x537   :  { %v579_v3 = vpop.f32.mrf.mxu1 }
 0x538   :  { %v582_v13 = vadd.f32 %v579_v3, %v140_v9  ;;  %v73_v3 = vld [vmem:[%s2492_s0 + $0x18] sm:$0xff] }
 0x539   :  { %1771 = vmatmul.msk.f32.gmra.mxu0 %vm87_vm2, %v73_v3 }
 0x53a   :  { %1860 = vtanh.f32 %v582_v13  ;;  %v1787_v17 = vmul.f32 -1.442695, %v582_v13 }
 0x53c   :  { %v496_v14 = vpop.f32.mrf.mxu3 }
 0x53d   :  { %v499_v15 = vadd.f32 %v496_v14, %v469_v4 }
 0x53f   :  { %1862 = vtanh.f32 %v499_v15  ;;  %v1785_v18 = vmul.f32 -1.442695, %v499_v15 }
 0x540   :  { %v1861_v7 = vpop.eup %1860  ;;  %1864 = vpow2.f32 %v1787_v17 }
 0x541   :  { %610 = vrot.lane.b32.xlu1 %v1861_v7, %s2048_s19  ;;  %1866 = vpow2.f32 %v1785_v18  ;;  %v1829_v7 = vld [vmem:[%s2498_s6] ss:$0 sm:$0xff] }
 0x545   :  { %v1863_v16 = vpop.eup %1862 }
 0x546   :  { %527 = vrot.lane.b32.xlu0 %v1863_v16, %s2048_s19  ;;  %v1865_v19 = vpop.eup %1864 }
 0x547   :  { %v586_v20 = vadd.f32 1.0, %v1865_v19  ;;  %v1867_v21 = vpop.eup %1866 }
 0x548   :  { %v503_v22 = vadd.f32 1.0, %v1867_v21 }
 0x549   :  { %605 = vrot.lane.b32.xlu1 %v603_v8, %s2049_s20  ;;  %1868 = vrcp.f32 %v586_v20  ;;  %v598_v31 = vand.u32 2147483648, %v586_v20  ;;  %vm592_vm1 = vweird.f32 %v586_v20  ;;  %v596_v33 = vand.u32 2147483647, %v586_v20 }
 0x54a   :  { %1870 = vrcp.f32 %v503_v22  ;;  %v515_v37 = vand.u32 2147483648, %v503_v22  ;;  %vm509_vm6 = vweird.f32 %v503_v22  ;;  %v513_v47 = vand.u32 2147483647, %v503_v22 }
 0x54b   :  { %v599_v35 = vor.u32 1.1754944e-38, %v598_v31  ;;  %vm597_vm5 = vcmp.eq.f32.partialorder %v596_v33, 8.507059e+37 }
 0x54c   :  { %v516_v51 = vor.u32 1.1754944e-38, %v515_v37  ;;  %vm514_vm8 = vcmp.eq.f32.partialorder %v513_v47, 8.507059e+37 }
 0x54f   :  { %v1869_v23 = vpop.eup %1868 }
 0x550   :  { %v588_v24 = vmul.f32 %v1869_v23, %v586_v20  ;;  %v1871_v25 = vpop.eup %1870  ;;  %vm593_vm15 = vweird.f32 %v1869_v23 }
 0x551   :  { %v505_v27 = vmul.f32 %v1871_v25, %v503_v22  ;;  %vm594_vm3 = vmor %vm592_vm1, %vm593_vm15  ;;  %vm510_vm4 = vweird.f32 %v1871_v25 }
 0x552   :  { %v589_v26 = vsub.f32 1.0, %v588_v24  ;;  %vm511_vm7 = vmor %vm509_vm6, %vm510_vm4 }
 0x553   :  { %v506_v29 = vsub.f32 1.0, %v505_v27 }
 0x554   :  { %v590_v28 = vmul.f32 %v1869_v23, %v589_v26 }
 0x555   :  { %v507_v32 = vmul.f32 %v1871_v25, %v506_v29 }
 0x556   :  { %v591_v30 = vadd.f32 %v1869_v23, %v590_v28 }
 0x557   :  { %v508_v36 = vadd.f32 %v1871_v25, %v507_v32 }
 0x558   :  { %v595_v34 = vsel %vm594_vm3, %v1869_v23, %v591_v30 }
 0x559   :  { %v600_v38 = vsel %vm597_vm5, %v599_v35, %v595_v34  ;;  %v512_v50 = vsel %vm511_vm7, %v1871_v25, %v508_v36 }
 0x55a   :  { %v517_v53 = vsel %vm514_vm8, %v516_v51, %v512_v50 }
 0x55b   :  { %v525_v61 = vmul.f32 %v523_v55, %v517_v53 }
 0x5b3   :  { %v611_v46 = vpop.permute.xlu1 %610 }
 0x5b4   :  { %v613_v49 = vmul.f32 %v611_v46, %v600_v38 }
 0x5b6   :  { %615 = vrot.lane.b32.xlu2 %v613_v49, %s2049_s20 }
 0x5b8   :  { %v528_v52 = vpop.permute.xlu0 %527 }
 0x5b9   :  { %v530_v54 = vmul.f32 %v528_v52, %v517_v53 }
 0x5bb   :  { %532 = vrot.lane.b32.xlu0 %v530_v54, %s2049_s20  ;;  %v606_v56 = vpop.permute.xlu1 %605 }
 0x5bc   :  { %v608_v57 = vmul.f32 %v606_v56, %v600_v38 }
 0x610   :  { %v616_v58 = vpop.permute.xlu2 %615 }
 0x611   :  { %v618_v59 = vadd.f32 %v616_v58, %v608_v57 }
 0x613   :  { %1872 = vtanh.f32 %v618_v59 }
 0x619   :  { %v1873_v60 = vpop.eup %1872 }
 0x61a   :  { %621 = vrot.lane.b32.xlu1 %v1873_v60, %s2048_s19 }
 0x62d   :  { %v533_v62 = vpop.permute.xlu0 %532 }
 0x62e   :  { %v535_v63 = vadd.f32 %v533_v62, %v525_v61 }
 0x630   :  { %1874 = vtanh.f32 %v535_v63  ;;  %543 = vrot.lane.b32.xlu1 %v535_v63, %s2050_s27 }
 0x636   :  { %v1875_v0 = vpop.eup %1874 }
 0x637   :  { %538 = vrot.lane.b32.xlu0 %v1875_v0, %s2048_s19 }
 0x68c   :  { %v622_v1 = vpop.permute.xlu1 %621 }
 0x68d   :  { %v624_v2 = vmul.f32 %v622_v1, %v600_v38 }
 0x68f   :  { %631 = vrot.lane.b32.xlu0 %v624_v2, %s2049_s20 }
 0x6a2   :  { %v544_v5 = vpop.permute.xlu1 %543 }
 0x6a3   :  { %546 = vst.msk [vmem:[#allocation6] sm:$0xff] %vm65_vm0, %v544_v5 }
 0x6a9   :  { %v539_v6 = vpop.permute.xlu0 %538 }
 0x6aa   :  { %v541_v9 = vmul.f32 %v539_v6, %v517_v53  ;;  %v714_v10 = vld [vmem:[#allocation6] sm:$0xff] }
 0x6ac   :  { %548 = vrot.lane.b32.xlu2 %v541_v9, %s2049_s20 }
 0x6b4   :  { %626 = vrot.lane.b32.xlu2 %v618_v59, %s2050_s27 }
 0x6bc   :  { %716 = vrot.lane.b32.xlu2 %v714_v10, %s2049_s20 }
 0x701   :  { %v632_v11 = vpop.permute.xlu0 %631 }
 0x702   :  { %634 = vst.msk [vmem:[#allocation3] sm:$0xff] %vm65_vm0, %v632_v11  ;;  %1788 = vmatmul.msk.f32.vlgmr.msra.gmra.mxu2 %vm65_vm0, %v632_v11  ;;  %v74_v11 = vld [vmem:[%s2492_s0 + $0x20] sm:$0xff] }
 0x703   :  { %1045 = vmatpush.msra.mxu2 %v2177_v39  ;;  %v142_v39 = vpop.f32.mrf.mxu0  ;;  %1772 = vmatmul.msk.f32.gmra.mxu0 %vm87_vm2, %v74_v11  ;;  %v1140_v11 = vld [vmem:[%s2494_s2 + $0x18] sm:$0xff] }
 0x705   :  { %1046 = vmatpush.msra.mxu2 %v2182_v40  ;;  %v143_v40 = vadd.f32 %v2167_v12, %v142_v39 }
 0x706   :  { %v549_v13 = vpop.permute.xlu2 %548 }
 0x707   :  { %551 = vst.msk [vmem:[#allocation5] sm:$0xff] %vm65_vm0, %v549_v13  ;;  %1047 = vmatpush.msra.mxu2 %v2193_v43 }
 0x709   :  { %v748_v4 = vld [vmem:[#allocation3] sm:$0xff]  ;;  %1048 = vmatpush.msra.mxu2 %v2202_v45 }
 0x70a   :  { %1791 = vmatmul.msk.f32.vlgmr.msrb.gmra.mxu1 %vm65_vm0, %v748_v4 }
 0x70b   :  { %1156 = vmatpush.msrb.mxu1 %v1140_v11 }
 0x70e   :  { %v627_v14 = vpop.permute.xlu2 %626  ;;  %v665_v15 = vld [vmem:[#allocation5] sm:$0xff] }
 0x70f   :  { %629 = vst.msk [vmem:[#allocation4] sm:$0xff] %vm65_vm0, %v627_v14  ;;  %1789 = vmatmul.msk.f32.vlgmr.msra.gmra.mxu3 %vm65_vm0, %v665_v15 }
 0x710   :  { %1073 = vmatpush.msra.mxu3 %v2184_v41 }
 0x712   :  { %1074 = vmatpush.msra.mxu3 %v2188_v42 }
 0x714   :  { %1075 = vmatpush.msra.mxu3 %v2195_v44 }
 0x716   :  { %1076 = vmatpush.msra.mxu3 %v2213_v48  ;;  %v797_v44 = vld [vmem:[#allocation4] sm:$0xff]  ;;  %v717_v56 = vpop.permute.xlu2 %716 }
 0x785   :  { %v662_v16 = vpop.f32.mrf.mxu2 }
 0x786   :  { %v663_v17 = vadd.f32 %v1829_v7, %v662_v16 }
 0x787   :  { %v773_v43 = vpop.f32.mrf.mxu1 }
 0x788   :  { %v776_v45 = vadd.f32 %v773_v43, %v143_v40  ;;  %v145_v40 = vpop.f32.mrf.mxu0 }
 0x789   :  { %v146_v43 = vadd.f32 %v2167_v12, %v145_v40 }
 0x78a   :  { %1876 = vtanh.f32 %v776_v45  ;;  %v1792_v18 = vmul.f32 -1.442695, %v776_v45 }
 0x790   :  { %v1877_v8 = vpop.eup %1876 }
 0x791   :  { %804 = vrot.lane.b32.xlu1 %v1877_v8, %s2048_s19  ;;  %v1830_v8 = vld [vmem:[%s2498_s6] ss:$0 sm:$0xff] }
 0x792   :  { %v690_v41 = vpop.f32.mrf.mxu3 }
 0x793   :  { %v693_v42 = vadd.f32 %v690_v41, %v663_v17 }
 0x795   :  { %1878 = vtanh.f32 %v693_v42  ;;  %v1790_v20 = vmul.f32 -1.442695, %v693_v42 }
 0x796   :  { %1880 = vpow2.f32 %v1792_v18 }
 0x797   :  { %1882 = vpow2.f32 %v1790_v20 }
 0x799   :  { %799 = vrot.lane.b32.xlu1 %v797_v44, %s2049_s20 }
 0x79b   :  { %v1879_v48 = vpop.eup %1878 }
 0x79c   :  { %721 = vrot.lane.b32.xlu0 %v1879_v48, %s2048_s19  ;;  %v1881_v19 = vpop.eup %1880 }
 0x79d   :  { %v780_v21 = vadd.f32 1.0, %v1881_v19  ;;  %v1883_v22 = vpop.eup %1882 }
 0x79e   :  { %v697_v24 = vadd.f32 1.0, %v1883_v22 }
 0x79f   :  { %1884 = vrcp.f32 %v780_v21  ;;  %v792_v31 = vand.u32 2147483648, %v780_v21  ;;  %vm786_vm10 = vweird.f32 %v780_v21  ;;  %v790_v32 = vand.u32 2147483647, %v780_v21 }
 0x7a0   :  { %1886 = vrcp.f32 %v697_v24  ;;  %v709_v49 = vand.u32 2147483648, %v697_v24  ;;  %vm703_vm14 = vweird.f32 %v697_v24  ;;  %v707_v50 = vand.u32 2147483647, %v697_v24 }
 0x7a1   :  { %v793_v35 = vor.u32 1.1754944e-38, %v792_v31  ;;  %vm791_vm12 = vcmp.eq.f32.partialorder %v790_v32, 8.507059e+37 }
 0x7a2   :  { %v710_v52 = vor.u32 1.1754944e-38, %v709_v49  ;;  %vm708_vm1 = vcmp.eq.f32.partialorder %v707_v50, 8.507059e+37 }
 0x7a5   :  { %v1885_v23 = vpop.eup %1884 }
 0x7a6   :  { %v782_v25 = vmul.f32 %v1885_v23, %v780_v21  ;;  %v1887_v28 = vpop.eup %1886  ;;  %vm787_vm9 = vweird.f32 %v1885_v23 }
 0x7a7   :  { %v699_v30 = vmul.f32 %v1887_v28, %v697_v24  ;;  %vm788_vm11 = vmor %vm786_vm10, %vm787_vm9  ;;  %vm704_vm13 = vweird.f32 %v1887_v28 }
 0x7a8   :  { %v783_v26 = vsub.f32 1.0, %v782_v25  ;;  %vm705_vm15 = vmor %vm703_vm14, %vm704_vm13 }
 0x7a9   :  { %v700_v34 = vsub.f32 1.0, %v699_v30 }
 0x7aa   :  { %v784_v27 = vmul.f32 %v1885_v23, %v783_v26 }
 0x7ab   :  { %v701_v46 = vmul.f32 %v1887_v28, %v700_v34 }
 0x7ac   :  { %v785_v29 = vadd.f32 %v1885_v23, %v784_v27 }
 0x7ad   :  { %v702_v47 = vadd.f32 %v1887_v28, %v701_v46 }
 0x7ae   :  { %v789_v33 = vsel %vm788_vm11, %v1885_v23, %v785_v29 }
 0x7af   :  { %v794_v36 = vsel %vm791_vm12, %v793_v35, %v789_v33  ;;  %v706_v51 = vsel %vm705_vm15, %v1887_v28, %v702_v47 }
 0x7b0   :  { %v711_v54 = vsel %vm708_vm1, %v710_v52, %v706_v51 }
 0x7b1   :  { %v719_v62 = vmul.f32 %v717_v56, %v711_v54 }
 0x803   :  { %v805_v37 = vpop.permute.xlu1 %804 }
 0x804   :  { %v807_v38 = vmul.f32 %v805_v37, %v794_v36 }
 0x806   :  { %809 = vrot.lane.b32.xlu2 %v807_v38, %s2049_s20 }
 0x80b   :  { %v800_v57 = vpop.permute.xlu1 %799 }
 0x80c   :  { %v802_v58 = vmul.f32 %v800_v57, %v794_v36 }
 0x80e   :  { %v722_v53 = vpop.permute.xlu0 %721 }
 0x80f   :  { %v724_v55 = vmul.f32 %v722_v53, %v711_v54 }
 0x811   :  { %726 = vrot.lane.b32.xlu0 %v724_v55, %s2049_s20 }
 0x860   :  { %v810_v59 = vpop.permute.xlu2 %809 }
 0x861   :  { %v812_v60 = vadd.f32 %v810_v59, %v802_v58 }
 0x863   :  { %1888 = vtanh.f32 %v812_v60 }
 0x869   :  { %v1889_v61 = vpop.eup %1888 }
 0x86a   :  { %815 = vrot.lane.b32.xlu1 %v1889_v61, %s2048_s19 }
 0x883   :  { %v727_v63 = vpop.permute.xlu0 %726 }
 0x884   :  { %v729_v0 = vadd.f32 %v727_v63, %v719_v62 }
 0x886   :  { %1890 = vtanh.f32 %v729_v0  ;;  %737 = vrot.lane.b32.xlu1 %v729_v0, %s2050_s27 }
 0x88c   :  { %v1891_v1 = vpop.eup %1890 }
 0x88d   :  { %732 = vrot.lane.b32.xlu0 %v1891_v1, %s2048_s19 }
 0x8dc   :  { %v816_v2 = vpop.permute.xlu1 %815 }
 0x8dd   :  { %v818_v5 = vmul.f32 %v816_v2, %v794_v36 }
 0x8df   :  { %825 = vrot.lane.b32.xlu0 %v818_v5, %s2049_s20 }
 0x8f8   :  { %v738_v6 = vpop.permute.xlu1 %737 }
 0x8f9   :  { %740 = vst.msk [vmem:[#allocation6] sm:$0xff] %vm65_vm0, %v738_v6 }
 0x8ff   :  { %v733_v9 = vpop.permute.xlu0 %732 }
 0x900   :  { %v735_v10 = vmul.f32 %v733_v9, %v711_v54  ;;  %v908_v3 = vld [vmem:[#allocation6] sm:$0xff] }
 0x902   :  { %742 = vrot.lane.b32.xlu2 %v735_v10, %s2049_s20 }
 0x90a   :  { %820 = vrot.lane.b32.xlu2 %v812_v60, %s2050_s27 }
 0x912   :  { %910 = vrot.lane.b32.xlu2 %v908_v3, %s2049_s20 }
 0x951   :  { %v826_v13 = vpop.permute.xlu0 %825 }
 0x952   :  { %828 = vst.msk [vmem:[#allocation3] sm:$0xff] %vm65_vm0, %v826_v13  ;;  %1793 = vmatmul.msk.f32.vlgmr.msrb.gmra.mxu2 %vm65_vm0, %v826_v13  ;;  %v1139_v13 = vld [vmem:[%s2494_s2 + $0x10] sm:$0xff] }
 0x953   :  { %1157 = vmatpush.msrb.mxu1 %v1139_v13 }
 0x959   :  { %v942_v4 = vld [vmem:[#allocation3] sm:$0xff] }
 0x95a   :  { %1796 = vmatmul.msk.f32.vlgmr.msra.gmra.mxu1 %vm65_vm0, %v942_v4  ;;  %v75_v4 = vld [vmem:[%s2492_s0 + $0x28] sm:$0xff] }
 0x95b   :  { %1773 = vmatmul.msk.f32.gmra.mxu0 %vm87_vm2, %v75_v4  ;;  %v1219_v4 = vld [vmem:[%s2496_s4 + $0x10] sm:$0xff] }
 0x95c   :  { %v743_v14 = vpop.permute.xlu2 %742 }
 0x95d   :  { %745 = vst.msk [vmem:[#allocation5] sm:$0xff] %vm65_vm0, %v743_v14  ;;  %v1138_v14 = vld [vmem:[%s2494_s2 + $0x8] sm:$0xff] }
 0x95e   :  { %1158 = vmatpush.msrb.mxu1 %v1138_v14 }
 0x964   :  { %v821_v15 = vpop.permute.xlu2 %820  ;;  %v859_v39 = vld [vmem:[#allocation5] sm:$0xff] }
 0x965   :  { %823 = vst.msk [vmem:[#allocation4] sm:$0xff] %vm65_vm0, %v821_v15  ;;  %1794 = vmatmul.msk.f32.vlgmr.msrb.gmra.mxu3 %vm65_vm0, %v859_v39  ;;  %v1137_v15 = vld [vmem:[%s2494_s2] sm:$0xff] }
 0x966   :  { %1159 = vmatpush.msrb.mxu1 %v1137_v15 }
 0x968   :  { %1350 = vmatpush.msra.mxu1 %v1140_v11 }
 0x96a   :  { %1351 = vmatpush.msra.mxu1 %v1139_v13 }
 0x96c   :  { %v991_v42 = vld [vmem:[#allocation4] sm:$0xff]  ;;  %v911_v56 = vpop.permute.xlu2 %910  ;;  %1352 = vmatpush.msra.mxu1 %v1138_v14 }
 0x96e   :  { %1353 = vmatpush.msra.mxu1 %v1137_v15 }
 0x9d5   :  { %v856_v17 = vpop.f32.mrf.mxu2 }
 0x9d6   :  { %v857_v41 = vadd.f32 %v1830_v8, %v856_v17  ;;  %v2385_v8 = vld [vmem:[%s2495_s3] ss:$0 sm:$0xff] }
 0x9d7   :  { %v967_v45 = vpop.f32.mrf.mxu1 }
 0x9d8   :  { %v970_v7 = vadd.f32 %v967_v45, %v146_v43 }
 0x9da   :  { %1892 = vtanh.f32 %v970_v7  ;;  %v1797_v12 = vmul.f32 -1.442695, %v970_v7 }
 0x9e0   :  { %v1893_v16 = vpop.eup %1892 }
 0x9e1   :  { %998 = vrot.lane.b32.xlu1 %v1893_v16, %s2048_s19  ;;  %v148_v16 = vpop.f32.mrf.mxu0 }
 0x9e2   :  { %v149_v17 = vadd.f32 %v2385_v8, %v148_v16  ;;  %v1251_v16 = vld [vmem:[#allocation7 + $0x18] sm:$0xff] }
 0x9e3   :  { %1267 = vmatpush.msrb.mxu3 %v1251_v16 }
 0x9e8   :  { %v884_v44 = vpop.f32.mrf.mxu3 }
 0x9e9   :  { %993 = vrot.lane.b32.xlu1 %v991_v42, %s2049_s20  ;;  %v887_v48 = vadd.f32 %v884_v44, %v857_v41 }
 0x9eb   :  { %1894 = vtanh.f32 %v887_v48  ;;  %v1795_v21 = vmul.f32 -1.442695, %v887_v48 }
 0x9ec   :  { %1896 = vpow2.f32 %v1797_v12 }
 0x9f1   :  { %v1895_v18 = vpop.eup %1894 }
 0x9f2   :  { %915 = vrot.lane.b32.xlu0 %v1895_v18, %s2048_s19  ;;  %v1897_v19 = vpop.eup %1896  ;;  %v1831_v18 = vld [vmem:[%s2498_s6] ss:$0 sm:$0xff] }
 0x9f3   :  { %v974_v20 = vadd.f32 1.0, %v1897_v19 }
 0x9f5   :  { %1898 = vrcp.f32 %v974_v20  ;;  %v986_v29 = vand.u32 2147483648, %v974_v20  ;;  %vm980_vm4 = vweird.f32 %v974_v20  ;;  %v984_v30 = vand.u32 2147483647, %v974_v20 }
 0x9f6   :  { %1900 = vpow2.f32 %v1795_v21 }
 0x9f7   :  { %v987_v33 = vor.u32 1.1754944e-38, %v986_v29  ;;  %vm985_vm6 = vcmp.eq.f32.partialorder %v984_v30, 8.507059e+37 }
 0x9fb   :  { %v1899_v22 = vpop.eup %1898 }
 0x9fc   :  { %v976_v23 = vmul.f32 %v1899_v22, %v974_v20  ;;  %v1901_v24 = vpop.eup %1900  ;;  %vm981_vm3 = vweird.f32 %v1899_v22 }
 0x9fd   :  { %v891_v26 = vadd.f32 1.0, %v1901_v24  ;;  %vm982_vm5 = vmor %vm980_vm4, %vm981_vm3 }
 0x9fe   :  { %v977_v25 = vsub.f32 1.0, %v976_v23 }
 0x9ff   :  { %1902 = vrcp.f32 %v891_v26  ;;  %v903_v49 = vand.u32 2147483648, %v891_v26  ;;  %vm897_vm8 = vweird.f32 %v891_v26  ;;  %v901_v50 = vand.u32 2147483647, %v891_v26 }
 0xa00   :  { %v978_v27 = vmul.f32 %v1899_v22, %v977_v25 }
 0xa01   :  { %v904_v52 = vor.u32 1.1754944e-38, %v903_v49  ;;  %vm902_vm10 = vcmp.eq.f32.partialorder %v901_v50, 8.507059e+37 }
 0xa02   :  { %v979_v28 = vadd.f32 %v1899_v22, %v978_v27 }
 0xa04   :  { %v983_v32 = vsel %vm982_vm5, %v1899_v22, %v979_v28 }
 0xa05   :  { %v1903_v31 = vpop.eup %1902  ;;  %v988_v35 = vsel %vm985_vm6, %v987_v33, %v983_v32 }
 0xa06   :  { %v893_v34 = vmul.f32 %v1903_v31, %v891_v26  ;;  %vm898_vm7 = vweird.f32 %v1903_v31 }
 0xa07   :  { %vm899_vm9 = vmor %vm897_vm8, %vm898_vm7 }
 0xa08   :  { %v894_v38 = vsub.f32 1.0, %v893_v34 }
 0xa0a   :  { %v895_v46 = vmul.f32 %v1903_v31, %v894_v38 }
 0xa0c   :  { %v896_v47 = vadd.f32 %v1903_v31, %v895_v46 }
 0xa0e   :  { %v900_v51 = vsel %vm899_vm9, %v1903_v31, %v896_v47 }
 0xa0f   :  { %v905_v54 = vsel %vm902_vm10, %v904_v52, %v900_v51 }
 0xa10   :  { %v913_v62 = vmul.f32 %v911_v56, %v905_v54 }
 0xa53   :  { %v999_v36 = vpop.permute.xlu1 %998 }
 0xa54   :  { %v1001_v37 = vmul.f32 %v999_v36, %v988_v35 }
 0xa56   :  { %1003 = vrot.lane.b32.xlu2 %v1001_v37, %s2049_s20 }
 0xa5b   :  { %v994_v57 = vpop.permute.xlu1 %993 }
 0xa5c   :  { %v996_v58 = vmul.f32 %v994_v57, %v988_v35 }
 0xa64   :  { %v916_v53 = vpop.permute.xlu0 %915 }
 0xa65   :  { %v918_v55 = vmul.f32 %v916_v53, %v905_v54 }
 0xa67   :  { %920 = vrot.lane.b32.xlu0 %v918_v55, %s2049_s20 }
 0xab0   :  { %v1004_v59 = vpop.permute.xlu2 %1003 }
 0xab1   :  { %v1006_v60 = vadd.f32 %v1004_v59, %v996_v58 }
 0xab3   :  { %1904 = vtanh.f32 %v1006_v60 }
 0xab9   :  { %v1905_v61 = vpop.eup %1904 }
 0xaba   :  { %1009 = vrot.lane.b32.xlu1 %v1905_v61, %s2048_s19 }
 0xad9   :  { %v921_v63 = vpop.permute.xlu0 %920 }
 0xada   :  { %v923_v0 = vadd.f32 %v921_v63, %v913_v62 }
 0xadc   :  { %1906 = vtanh.f32 %v923_v0  ;;  %931 = vrot.lane.b32.xlu1 %v923_v0, %s2050_s27 }
 0xae2   :  { %v1907_v1 = vpop.eup %1906 }
 0xae3   :  { %926 = vrot.lane.b32.xlu0 %v1907_v1, %s2048_s19 }
 0xb2c   :  { %v1010_v2 = vpop.permute.xlu1 %1009 }
 0xb2d   :  { %v1012_v5 = vmul.f32 %v1010_v2, %v988_v35 }
 0xb2f   :  { %1019 = vrot.lane.b32.xlu0 %v1012_v5, %s2049_s20 }
 0xb4e   :  { %v932_v6 = vpop.permute.xlu1 %931 }
 0xb4f   :  { %934 = vst.msk [vmem:[#allocation6] sm:$0xff] %vm65_vm0, %v932_v6 }
 0xb55   :  { %v927_v9 = vpop.permute.xlu0 %926 }
 0xb56   :  { %v929_v10 = vmul.f32 %v927_v9, %v905_v54  ;;  %v1102_v3 = vld [vmem:[#allocation6] sm:$0xff] }
 0xb58   :  { %936 = vrot.lane.b32.xlu2 %v929_v10, %s2049_s20 }
 0xb60   :  { %1014 = vrot.lane.b32.xlu2 %v1006_v60, %s2050_s27 }
 0xb68   :  { %1104 = vrot.lane.b32.xlu2 %v1102_v3, %s2049_s20 }
 0xba1   :  { %v1020_v39 = vpop.permute.xlu0 %1019 }
 0xba2   :  { %1022 = vst.msk [vmem:[#allocation3] sm:$0xff] %vm65_vm0, %v1020_v39  ;;  %1798 = vmatmul.msk.f32.vlgmr.msra.gmra.mxu2 %vm65_vm0, %v1020_v39 }
 0xba9   :  { %v1136_v40 = vld [vmem:[#allocation3] sm:$0xff] }
 0xbaa   :  { %1801 = vmatmul.msk.f32.vlgmr.msrb.gmra.mxu1 %vm65_vm0, %v1136_v40 }
 0xbab   :  { %1544 = vmatpush.msrb.mxu1 %v1140_v11 }
 0xbad   :  { %1545 = vmatpush.msrb.mxu1 %v1139_v13  ;;  %v1220_v13 = vld [vmem:[%s2496_s4 + $0x18] sm:$0xff] }
 0xbae   :  { %1239 = vmatpush.msrb.mxu2 %v1220_v13 }
 0xbaf   :  { %1546 = vmatpush.msrb.mxu1 %v1138_v14  ;;  %v1218_v14 = vld [vmem:[%s2496_s4 + $0x8] sm:$0xff] }
 0xbb0   :  { %1240 = vmatpush.msrb.mxu2 %v1219_v4 }
 0xbb1   :  { %1547 = vmatpush.msrb.mxu1 %v1137_v15  ;;  %v1217_v15 = vld [vmem:[%s2496_s4] sm:$0xff] }
 0xbb2   :  { %v937_v43 = vpop.permute.xlu2 %936  ;;  %1241 = vmatpush.msrb.mxu2 %v1218_v14 }
 0xbb3   :  { %939 = vst.msk [vmem:[#allocation5] sm:$0xff] %vm65_vm0, %v937_v43 }
 0xbb4   :  { %1242 = vmatpush.msrb.mxu2 %v1217_v15 }
 0xbb6   :  { %1433 = vmatpush.msra.mxu2 %v1220_v13 }
 0xbb8   :  { %1434 = vmatpush.msra.mxu2 %v1219_v4 }
 0xbba   :  { %v1015_v45 = vpop.permute.xlu2 %1014  ;;  %v1053_v7 = vld [vmem:[#allocation5] sm:$0xff]  ;;  %1435 = vmatpush.msra.mxu2 %v1218_v14 }
 0xbbb   :  { %1017 = vst.msk [vmem:[#allocation4] sm:$0xff] %vm65_vm0, %v1015_v45  ;;  %1799 = vmatmul.msk.f32.vlgmr.msra.gmra.mxu3 %vm65_vm0, %v1053_v7  ;;  %v76_v7 = vld [vmem:[%s2492_s0 + $0x30] sm:$0xff] }
 0xbbc   :  { %1436 = vmatpush.msra.mxu2 %v1217_v15  ;;  %1774 = vmatmul.msk.f32.gmra.mxu0 %vm87_vm2, %v76_v7 }
 0xbc2   :  { %v1185_v48 = vld [vmem:[#allocation4] sm:$0xff]  ;;  %v1105_v61 = vpop.permute.xlu2 %1104 }
 0xc25   :  { %v1050_v12 = vpop.f32.mrf.mxu2 }
 0xc26   :  { %v1051_v19 = vadd.f32 %v1831_v18, %v1050_v12 }
 0xc27   :  { %v1161_v41 = vpop.f32.mrf.mxu1 }
 0xc28   :  { %v1164_v42 = vadd.f32 %v1161_v41, %v149_v17  ;;  %v1250_v17 = vld [vmem:[#allocation7 + $0x10] sm:$0xff]  ;;  %v1249_v41 = vld [vmem:[#allocation7 + $0x8] sm:$0xff] }
 0xc29   :  { %1268 = vmatpush.msrb.mxu3 %v1250_v17 }
 0xc2a   :  { %1908 = vtanh.f32 %v1164_v42  ;;  %v1802_v23 = vmul.f32 -1.442695, %v1164_v42  ;;  %v1248_v42 = vld [vmem:[#allocation7] sm:$0xff] }
 0xc2b   :  { %1269 = vmatpush.msrb.mxu3 %v1249_v41 }
 0xc2d   :  { %1270 = vmatpush.msrb.mxu3 %v1248_v42 }
 0xc2f   :  { %1461 = vmatpush.msra.mxu3 %v1251_v16 }
 0xc30   :  { %v1909_v44 = vpop.eup %1908 }
 0xc31   :  { %1192 = vrot.lane.b32.xlu1 %v1909_v44, %s2048_s19  ;;  %1462 = vmatpush.msra.mxu3 %v1250_v17 }
 0xc33   :  { %1463 = vmatpush.msra.mxu3 %v1249_v41 }
 0xc35   :  { %1464 = vmatpush.msra.mxu3 %v1248_v42 }
 0xc39   :  { %1187 = vrot.lane.b32.xlu1 %v1185_v48, %s2049_s20 }
 0xc3e   :  { %v1078_v20 = vpop.f32.mrf.mxu3 }
 0xc3f   :  { %v1081_v21 = vadd.f32 %v1078_v20, %v1051_v19  ;;  %v151_v20 = vpop.f32.mrf.mxu0 }
 0xc41   :  { %1910 = vtanh.f32 %v1081_v21  ;;  %v1800_v27 = vmul.f32 -1.442695, %v1081_v21  ;;  %v152_v21 = vadd.f32 %v2385_v8, %v151_v20 }
 0xc42   :  { %1912 = vpow2.f32 %v1802_v23 }
 0xc47   :  { %v1911_v22 = vpop.eup %1910 }
 0xc48   :  { %1109 = vrot.lane.b32.xlu0 %v1911_v22, %s2048_s19  ;;  %v1913_v24 = vpop.eup %1912 }
 0xc49   :  { %v1168_v25 = vadd.f32 1.0, %v1913_v24 }
 0xc4b   :  { %1914 = vrcp.f32 %v1168_v25  ;;  %v1180_v34 = vand.u32 2147483648, %v1168_v25  ;;  %vm1174_vm12 = vweird.f32 %v1168_v25  ;;  %v1178_v35 = vand.u32 2147483647, %v1168_v25 }
 0xc4c   :  { %1916 = vpow2.f32 %v1800_v27 }
 0xc4d   :  { %v1181_v37 = vor.u32 1.1754944e-38, %v1180_v34  ;;  %vm1179_vm14 = vcmp.eq.f32.partialorder %v1178_v35, 8.507059e+37 }
 0xc51   :  { %v1915_v26 = vpop.eup %1914 }
 0xc52   :  { %v1170_v28 = vmul.f32 %v1915_v26, %v1168_v25  ;;  %v1917_v30 = vpop.eup %1916  ;;  %vm1175_vm11 = vweird.f32 %v1915_v26 }
 0xc53   :  { %v1085_v32 = vadd.f32 1.0, %v1917_v30  ;;  %vm1176_vm13 = vmor %vm1174_vm12, %vm1175_vm11 }
 0xc54   :  { %v1171_v29 = vsub.f32 1.0, %v1170_v28 }
 0xc55   :  { %1918 = vrcp.f32 %v1085_v32  ;;  %v1097_v54 = vand.u32 2147483648, %v1085_v32  ;;  %vm1091_vm1 = vweird.f32 %v1085_v32  ;;  %v1095_v55 = vand.u32 2147483647, %v1085_v32 }
 0xc56   :  { %v1172_v31 = vmul.f32 %v1915_v26, %v1171_v29 }
 0xc57   :  { %v1098_v57 = vor.u32 1.1754944e-38, %v1097_v54  ;;  %vm1096_vm4 = vcmp.eq.f32.partialorder %v1095_v55, 8.507059e+37 }
 0xc58   :  { %v1173_v33 = vadd.f32 %v1915_v26, %v1172_v31 }
 0xc5a   :  { %v1177_v36 = vsel %vm1176_vm13, %v1915_v26, %v1173_v33  ;;  %v1832_v26 = vld [vmem:[%s2498_s6] ss:$0 sm:$0xff] }
 0xc5b   :  { %v1182_v38 = vsel %vm1179_vm14, %v1181_v37, %v1177_v36  ;;  %v1919_v49 = vpop.eup %1918 }
 0xc5c   :  { %v1087_v50 = vmul.f32 %v1919_v49, %v1085_v32  ;;  %vm1092_vm15 = vweird.f32 %v1919_v49 }
 0xc5d   :  { %vm1093_vm3 = vmor %vm1091_vm1, %vm1092_vm15 }
 0xc5e   :  { %v1088_v51 = vsub.f32 1.0, %v1087_v50 }
 0xc60   :  { %v1089_v52 = vmul.f32 %v1919_v49, %v1088_v51 }
 0xc62   :  { %v1090_v53 = vadd.f32 %v1919_v49, %v1089_v52 }
 0xc64   :  { %v1094_v56 = vsel %vm1093_vm3, %v1919_v49, %v1090_v53 }
 0xc65   :  { %v1099_v59 = vsel %vm1096_vm4, %v1098_v57, %v1094_v56 }
 0xc66   :  { %v1107_v5 = vmul.f32 %v1105_v61, %v1099_v59 }
 0xca3   :  { %v1193_v46 = vpop.permute.xlu1 %1192 }
 0xca4   :  { %v1195_v47 = vmul.f32 %v1193_v46, %v1182_v38 }
 0xca6   :  { %1197 = vrot.lane.b32.xlu2 %v1195_v47, %s2049_s20 }
 0xcab   :  { %v1188_v62 = vpop.permute.xlu1 %1187 }
 0xcac   :  { %v1190_v63 = vmul.f32 %v1188_v62, %v1182_v38 }
 0xcba   :  { %v1110_v58 = vpop.permute.xlu0 %1109 }
 0xcbb   :  { %v1112_v60 = vmul.f32 %v1110_v58, %v1099_v59 }
 0xcbd   :  { %1114 = vrot.lane.b32.xlu0 %v1112_v60, %s2049_s20 }
 0xd00   :  { %v1198_v0 = vpop.permute.xlu2 %1197 }
 0xd01   :  { %v1200_v1 = vadd.f32 %v1198_v0, %v1190_v63 }
 0xd03   :  { %1920 = vtanh.f32 %v1200_v1 }
 0xd09   :  { %v1921_v2 = vpop.eup %1920 }
 0xd0a   :  { %1203 = vrot.lane.b32.xlu1 %v1921_v2, %s2048_s19 }
 0xd2f   :  { %v1115_v6 = vpop.permute.xlu0 %1114 }
 0xd30   :  { %v1117_v9 = vadd.f32 %v1115_v6, %v1107_v5 }
 0xd32   :  { %1922 = vtanh.f32 %v1117_v9  ;;  %1125 = vrot.lane.b32.xlu1 %v1117_v9, %s2050_s27 }
 0xd38   :  { %v1923_v10 = vpop.eup %1922 }
 0xd39   :  { %1120 = vrot.lane.b32.xlu0 %v1923_v10, %s2048_s19 }
 0xd7c   :  { %v1204_v3 = vpop.permute.xlu1 %1203 }
 0xd7d   :  { %v1206_v11 = vmul.f32 %v1204_v3, %v1182_v38 }
 0xd7f   :  { %1213 = vrot.lane.b32.xlu0 %v1206_v11, %s2049_s20 }
 0xda4   :  { %v1126_v39 = vpop.permute.xlu1 %1125 }
 0xda5   :  { %1128 = vst.msk [vmem:[#allocation6] sm:$0xff] %vm65_vm0, %v1126_v39 }
 0xdab   :  { %v1121_v40 = vpop.permute.xlu0 %1120 }
 0xdac   :  { %v1123_v43 = vmul.f32 %v1121_v40, %v1099_v59  ;;  %v1296_v45 = vld [vmem:[#allocation6] sm:$0xff] }
 0xdae   :  { %1130 = vrot.lane.b32.xlu2 %v1123_v43, %s2049_s20 }
 0xdb6   :  { %1208 = vrot.lane.b32.xlu2 %v1200_v1, %s2050_s27 }
 0xdbe   :  { %1298 = vrot.lane.b32.xlu2 %v1296_v45, %s2049_s20 }
 0xdf1   :  { %v1214_v44 = vpop.permute.xlu0 %1213 }
 0xdf2   :  { %1216 = vst.msk [vmem:[#allocation3] sm:$0xff] %vm65_vm0, %v1214_v44  ;;  %1803 = vmatmul.msk.f32.vlgmr.msrb.gmra.mxu2 %vm65_vm0, %v1214_v44  ;;  %v77_v44 = vld [vmem:[%s2492_s0 + $0x38] sm:$0xff] }
 0xdf3   :  { %1627 = vmatpush.msrb.mxu2 %v1220_v13  ;;  %1775 = vmatmul.msk.f32.gmra.mxu0 %vm87_vm2, %v77_v44 }
 0xdf5   :  { %1628 = vmatpush.msrb.mxu2 %v1219_v4 }
 0xdf7   :  { %1629 = vmatpush.msrb.mxu2 %v1218_v14 }
 0xdf9   :  { %v1330_v48 = vld [vmem:[#allocation3] sm:$0xff]  ;;  %1630 = vmatpush.msrb.mxu2 %v1217_v15 }
 0xdfa   :  { %1806 = vmatmul.msk.f32.vlgmr.msra.gmra.mxu1 %vm65_vm0, %v1330_v48 }
 0xe08   :  { %v1131_v18 = vpop.permute.xlu2 %1130 }
 0xe09   :  { %1133 = vst.msk [vmem:[#allocation5] sm:$0xff] %vm65_vm0, %v1131_v18 }
 0xe10   :  { %v1209_v12 = vpop.permute.xlu2 %1208  ;;  %v1247_v19 = vld [vmem:[#allocation5] sm:$0xff] }
 0xe11   :  { %1211 = vst.msk [vmem:[#allocation4] sm:$0xff] %vm65_vm0, %v1209_v12  ;;  %1804 = vmatmul.msk.f32.vlgmr.msrb.gmra.mxu3 %vm65_vm0, %v1247_v19 }
 0xe12   :  { %1655 = vmatpush.msrb.mxu3 %v1251_v16 }
 0xe14   :  { %1656 = vmatpush.msrb.mxu3 %v1250_v17 }
 0xe16   :  { %1657 = vmatpush.msrb.mxu3 %v1249_v41 }
 0xe18   :  { %1658 = vmatpush.msrb.mxu3 %v1248_v42  ;;  %v1379_v25 = vld [vmem:[#allocation4] sm:$0xff]  ;;  %v1299_v10 = vpop.permute.xlu2 %1298 }
 0xe75   :  { %v1244_v27 = vpop.f32.mrf.mxu2 }
 0xe76   :  { %v1245_v28 = vadd.f32 %v1832_v26, %v1244_v27  ;;  %v1833_v27 = vld [vmem:[%s2498_s6] ss:$0 sm:$0xff] }
 0xe77   :  { %v1355_v22 = vpop.f32.mrf.mxu1 }
 0xe78   :  { %v1358_v23 = vadd.f32 %v1355_v22, %v152_v21  ;;  %v154_v21 = vpop.f32.mrf.mxu0 }
 0xe79   :  { %v155_v22 = vadd.f32 %v2385_v8, %v154_v21 }
 0xe7a   :  { %1924 = vtanh.f32 %v1358_v23  ;;  %v1807_v32 = vmul.f32 -1.442695, %v1358_v23 }
 0xe80   :  { %v1925_v24 = vpop.eup %1924 }
 0xe81   :  { %1386 = vrot.lane.b32.xlu1 %v1925_v24, %s2048_s19 }
 0xe89   :  { %1381 = vrot.lane.b32.xlu1 %v1379_v25, %s2049_s20 }
 0xe94   :  { %v1272_v29 = vpop.f32.mrf.mxu3 }
 0xe95   :  { %v1275_v30 = vadd.f32 %v1272_v29, %v1245_v28 }
 0xe97   :  { %1926 = vtanh.f32 %v1275_v30  ;;  %v1805_v37 = vmul.f32 -1.442695, %v1275_v30 }
 0xe98   :  { %1928 = vpow2.f32 %v1807_v32 }
 0xe9d   :  { %v1927_v31 = vpop.eup %1926 }
 0xe9e   :  { %1303 = vrot.lane.b32.xlu0 %v1927_v31, %s2048_s19  ;;  %v1929_v33 = vpop.eup %1928 }
 0xe9f   :  { %v1362_v34 = vadd.f32 1.0, %v1929_v33 }
 0xea1   :  { %1930 = vrcp.f32 %v1362_v34  ;;  %v1374_v49 = vand.u32 2147483648, %v1362_v34  ;;  %vm1368_vm6 = vweird.f32 %v1362_v34  ;;  %v1372_v51 = vand.u32 2147483647, %v1362_v34 }
 0xea2   :  { %1932 = vpow2.f32 %v1805_v37 }
 0xea3   :  { %v1375_v54 = vor.u32 1.1754944e-38, %v1374_v49  ;;  %vm1373_vm8 = vcmp.eq.f32.partialorder %v1372_v51, 8.507059e+37 }
 0xea7   :  { %v1931_v35 = vpop.eup %1930 }
 0xea8   :  { %v1364_v36 = vmul.f32 %v1931_v35, %v1362_v34  ;;  %vm1369_vm5 = vweird.f32 %v1931_v35  ;;  %v1933_v50 = vpop.eup %1932 }
 0xea9   :  { %vm1370_vm7 = vmor %vm1368_vm6, %vm1369_vm5  ;;  %v1279_v53 = vadd.f32 1.0, %v1933_v50 }
 0xeaa   :  { %v1365_v38 = vsub.f32 1.0, %v1364_v36 }
 0xeab   :  { %1934 = vrcp.f32 %v1279_v53  ;;  %v1291_v63 = vand.u32 2147483648, %v1279_v53  ;;  %vm1285_vm10 = vweird.f32 %v1279_v53  ;;  %v1289_v0 = vand.u32 2147483647, %v1279_v53 }
 0xeac   :  { %v1366_v46 = vmul.f32 %v1931_v35, %v1365_v38 }
 0xead   :  { %v1292_v2 = vor.u32 1.1754944e-38, %v1291_v63  ;;  %vm1290_vm12 = vcmp.eq.f32.partialorder %v1289_v0, 8.507059e+37 }
 0xeae   :  { %v1367_v47 = vadd.f32 %v1931_v35, %v1366_v46 }
 0xeb0   :  { %v1371_v52 = vsel %vm1370_vm7, %v1931_v35, %v1367_v47 }
 0xeb1   :  { %v1376_v55 = vsel %vm1373_vm8, %v1375_v54, %v1371_v52  ;;  %v1935_v58 = vpop.eup %1934 }
 0xeb2   :  { %v1281_v59 = vmul.f32 %v1935_v58, %v1279_v53  ;;  %vm1286_vm9 = vweird.f32 %v1935_v58 }
 0xeb3   :  { %vm1287_vm11 = vmor %vm1285_vm10, %vm1286_vm9 }
 0xeb4   :  { %v1282_v60 = vsub.f32 1.0, %v1281_v59 }
 0xeb6   :  { %v1283_v61 = vmul.f32 %v1935_v58, %v1282_v60 }
 0xeb8   :  { %v1284_v62 = vadd.f32 %v1935_v58, %v1283_v61 }
 0xeba   :  { %v1288_v1 = vsel %vm1287_vm11, %v1935_v58, %v1284_v62 }
 0xebb   :  { %v1293_v6 = vsel %vm1290_vm12, %v1292_v2, %v1288_v1 }
 0xebc   :  { %v1301_v15 = vmul.f32 %v1299_v10, %v1293_v6 }
 0xef3   :  { %v1387_v56 = vpop.permute.xlu1 %1386 }
 0xef4   :  { %v1389_v57 = vmul.f32 %v1387_v56, %v1376_v55 }
 0xef6   :  { %1391 = vrot.lane.b32.xlu2 %v1389_v57, %s2049_s20 }
 0xefb   :  { %v1382_v3 = vpop.permute.xlu1 %1381 }
 0xefc   :  { %v1384_v11 = vmul.f32 %v1382_v3, %v1376_v55 }
 0xf10   :  { %v1304_v5 = vpop.permute.xlu0 %1303 }
 0xf11   :  { %v1306_v9 = vmul.f32 %v1304_v5, %v1293_v6 }
 0xf13   :  { %1308 = vrot.lane.b32.xlu0 %v1306_v9, %s2049_s20 }
 0xf50   :  { %v1392_v13 = vpop.permute.xlu2 %1391 }
 0xf51   :  { %v1394_v4 = vadd.f32 %v1392_v13, %v1384_v11 }
 0xf53   :  { %1936 = vtanh.f32 %v1394_v4 }
 0xf59   :  { %v1937_v14 = vpop.eup %1936 }
 0xf5a   :  { %1397 = vrot.lane.b32.xlu1 %v1937_v14, %s2048_s19 }
 0xf85   :  { %v1309_v39 = vpop.permute.xlu0 %1308 }
 0xf86   :  { %v1311_v40 = vadd.f32 %v1309_v39, %v1301_v15 }
 0xf88   :  { %1938 = vtanh.f32 %v1311_v40  ;;  %1319 = vrot.lane.b32.xlu1 %v1311_v40, %s2050_s27 }
 0xf8e   :  { %v1939_v43 = vpop.eup %1938 }
 0xf8f   :  { %1314 = vrot.lane.b32.xlu0 %v1939_v43, %s2048_s19 }
 0xfcc   :  { %v1398_v45 = vpop.permute.xlu1 %1397 }
 0xfcd   :  { %v1400_v7 = vmul.f32 %v1398_v45, %v1376_v55 }
 0xfcf   :  { %1407 = vrot.lane.b32.xlu0 %v1400_v7, %s2049_s20 }
 0xffa   :  { %v1320_v16 = vpop.permute.xlu1 %1319 }
 0xffb   :  { %1322 = vst.msk [vmem:[#allocation6] sm:$0xff] %vm65_vm0, %v1320_v16 }
0x1001   :  { %v1315_v17 = vpop.permute.xlu0 %1314 }
0x1002   :  { %v1317_v41 = vmul.f32 %v1315_v17, %v1293_v6  ;;  %v1490_v42 = vld [vmem:[#allocation6] sm:$0xff] }
0x1004   :  { %1324 = vrot.lane.b32.xlu2 %v1317_v41, %s2049_s20 }
0x100c   :  { %1402 = vrot.lane.b32.xlu2 %v1394_v4, %s2050_s27 }
0x1014   :  { %1492 = vrot.lane.b32.xlu2 %v1490_v42, %s2049_s20 }
0x1041   :  { %v1408_v48 = vpop.permute.xlu0 %1407 }
0x1042   :  { %1410 = vst.msk [vmem:[#allocation3] sm:$0xff] %vm65_vm0, %v1408_v48  ;;  %1808 = vmatmul.msk.f32.vlgmr.msra.gmra.mxu2 %vm65_vm0, %v1408_v48 }
0x1049   :  { %v1524_v18 = vld [vmem:[#allocation3] sm:$0xff] }
0x104a   :  { %1811 = vmatmul.msk.f32.vlgmr.msrb.gmra.mxu1 %vm65_vm0, %v1524_v18 }
0x105e   :  { %v1325_v12 = vpop.permute.xlu2 %1324 }
0x105f   :  { %1327 = vst.msk [vmem:[#allocation5] sm:$0xff] %vm65_vm0, %v1325_v12  ;;  %v1834_v12 = vld [vmem:[%s2498_s6] ss:$0 sm:$0xff] }
0x1066   :  { %v1403_v19 = vpop.permute.xlu2 %1402  ;;  %v1441_v20 = vld [vmem:[#allocation5] sm:$0xff] }
0x1067   :  { %1405 = vst.msk [vmem:[#allocation4] sm:$0xff] %vm65_vm0, %v1403_v19  ;;  %1809 = vmatmul.msk.f32.vlgmr.msra.gmra.mxu3 %vm65_vm0, %v1441_v20 }
0x106e   :  { %v1573_v26 = vld [vmem:[#allocation4] sm:$0xff]  ;;  %v1493_v10 = vpop.permute.xlu2 %1492 }
0x10c5   :  { %v1438_v28 = vpop.f32.mrf.mxu2 }
0x10c6   :  { %v1439_v29 = vadd.f32 %v1833_v27, %v1438_v28 }
0x10c7   :  { %v1549_v23 = vpop.f32.mrf.mxu1 }
0x10c8   :  { %v1552_v24 = vadd.f32 %v1549_v23, %v155_v22 }
0x10ca   :  { %1940 = vtanh.f32 %v1552_v24  ;;  %v1812_v8 = vmul.f32 -1.442695, %v1552_v24 }
0x10d0   :  { %v1941_v25 = vpop.eup %1940 }
0x10d1   :  { %1580 = vrot.lane.b32.xlu1 %v1941_v25, %s2048_s19 }
0x10d9   :  { %1575 = vrot.lane.b32.xlu1 %v1573_v26, %s2049_s20 }
0x10ea   :  { %v1466_v30 = vpop.f32.mrf.mxu3 }
0x10eb   :  { %v1469_v31 = vadd.f32 %v1466_v30, %v1439_v29 }
0x10ed   :  { %1942 = vtanh.f32 %v1469_v31  ;;  %v1810_v46 = vmul.f32 -1.442695, %v1469_v31 }
0x10ee   :  { %1944 = vpow2.f32 %v1812_v8 }
0x10f3   :  { %v1943_v32 = vpop.eup %1942 }
0x10f4   :  { %1497 = vrot.lane.b32.xlu0 %v1943_v32, %s2048_s19  ;;  %v1945_v33 = vpop.eup %1944 }
0x10f5   :  { %v1556_v34 = vadd.f32 1.0, %v1945_v33 }
0x10f7   :  { %1946 = vrcp.f32 %v1556_v34  ;;  %v1568_v49 = vand.u32 2147483648, %v1556_v34  ;;  %vm1562_vm13 = vweird.f32 %v1556_v34  ;;  %v1566_v50 = vand.u32 2147483647, %v1556_v34 }
0x10f8   :  { %1948 = vpow2.f32 %v1810_v46 }
0x10f9   :  { %v1569_v52 = vor.u32 1.1754944e-38, %v1568_v49  ;;  %vm1567_vm15 = vcmp.eq.f32.partialorder %v1566_v50, 8.507059e+37 }
0x10fd   :  { %v1947_v35 = vpop.eup %1946 }
0x10fe   :  { %v1558_v36 = vmul.f32 %v1947_v35, %v1556_v34  ;;  %vm1563_vm2 = vweird.f32 %v1947_v35  ;;  %v1949_v55 = vpop.eup %1948 }
0x10ff   :  { %vm1564_vm14 = vmor %vm1562_vm13, %vm1563_vm2  ;;  %v1473_v57 = vadd.f32 1.0, %v1949_v55  ;;  %v1720_v55 = vld [vmem:[#allocation10 + $0x18] sm:$0xff] }
0x1100   :  { %v1559_v37 = vsub.f32 1.0, %v1558_v36  ;;  %1740 = vmatpush.msra.mxu1 %v1720_v55 }
0x1101   :  { %1950 = vrcp.f32 %v1473_v57  ;;  %v1485_v63 = vand.u32 2147483648, %v1473_v57  ;;  %vm1479_vm3 = vweird.f32 %v1473_v57  ;;  %v1483_v0 = vand.u32 2147483647, %v1473_v57 }
0x1102   :  { %v1560_v38 = vmul.f32 %v1947_v35, %v1559_v37 }
0x1103   :  { %v1486_v2 = vor.u32 1.1754944e-38, %v1485_v63  ;;  %vm1484_vm5 = vcmp.eq.f32.partialorder %v1483_v0, 8.507059e+37 }
0x1104   :  { %v1561_v47 = vadd.f32 %v1947_v35, %v1560_v38 }
0x1106   :  { %v1565_v51 = vsel %vm1564_vm14, %v1947_v35, %v1561_v47 }
0x1107   :  { %v1570_v53 = vsel %vm1567_vm15, %v1569_v52, %v1565_v51  ;;  %v1951_v58 = vpop.eup %1950 }
0x1108   :  { %v1475_v59 = vmul.f32 %v1951_v58, %v1473_v57  ;;  %vm1480_vm1 = vweird.f32 %v1951_v58  ;;  %v1718_v57 = vld [vmem:[#allocation10 + $0x8] sm:$0xff] }
0x1109   :  { %vm1481_vm4 = vmor %vm1479_vm3, %vm1480_vm1 }
0x110a   :  { %v1476_v60 = vsub.f32 1.0, %v1475_v59 }
0x110c   :  { %v1477_v61 = vmul.f32 %v1951_v58, %v1476_v60 }
0x110e   :  { %v1478_v62 = vadd.f32 %v1951_v58, %v1477_v61  ;;  %v1835_v61 = vld [vmem:[%s2500_s8] ss:$0 sm:$0xff] }
0x1110   :  { %v1482_v1 = vsel %vm1481_vm4, %v1951_v58, %v1478_v62  ;;  %v1717_v58 = vld [vmem:[#allocation10] sm:$0xff] }
0x1111   :  { %v1487_v6 = vsel %vm1484_vm5, %v1486_v2, %v1482_v1 }
0x1112   :  { %v1495_v15 = vmul.f32 %v1493_v10, %v1487_v6 }
0x1143   :  { %v1581_v54 = vpop.permute.xlu1 %1580 }
0x1144   :  { %v1583_v56 = vmul.f32 %v1581_v54, %v1570_v53 }
0x1146   :  { %1585 = vrot.lane.b32.xlu2 %v1583_v56, %s2049_s20  ;;  %v1719_v56 = vld [vmem:[#allocation10 + $0x10] sm:$0xff] }
0x1147   :  { %1741 = vmatpush.msra.mxu1 %v1719_v56 }
0x1149   :  { %1742 = vmatpush.msra.mxu1 %v1718_v57 }
0x114b   :  { %v1576_v3 = vpop.permute.xlu1 %1575  ;;  %1743 = vmatpush.msra.mxu1 %v1717_v58 }
0x114c   :  { %v1578_v11 = vmul.f32 %v1576_v3, %v1570_v53 }
0x1166   :  { %v1498_v5 = vpop.permute.xlu0 %1497 }
0x1167   :  { %v1500_v9 = vmul.f32 %v1498_v5, %v1487_v6 }
0x1169   :  { %1502 = vrot.lane.b32.xlu0 %v1500_v9, %s2049_s20 }
0x11a0   :  { %v1586_v13 = vpop.permute.xlu2 %1585 }
0x11a1   :  { %v1588_v4 = vadd.f32 %v1586_v13, %v1578_v11 }
0x11a3   :  { %1952 = vtanh.f32 %v1588_v4 }
0x11a9   :  { %v1953_v14 = vpop.eup %1952 }
0x11aa   :  { %1591 = vrot.lane.b32.xlu1 %v1953_v14, %s2048_s19 }
0x11db   :  { %v1503_v39 = vpop.permute.xlu0 %1502 }
0x11dc   :  { %v1505_v40 = vadd.f32 %v1503_v39, %v1495_v15 }
0x11de   :  { %1954 = vtanh.f32 %v1505_v40  ;;  %1513 = vrot.lane.b32.xlu1 %v1505_v40, %s2050_s27 }
0x11e4   :  { %v1955_v43 = vpop.eup %1954 }
0x11e5   :  { %1508 = vrot.lane.b32.xlu0 %v1955_v43, %s2048_s19 }
0x121c   :  { %v1592_v45 = vpop.permute.xlu1 %1591 }
0x121d   :  { %v1594_v7 = vmul.f32 %v1592_v45, %v1570_v53 }
0x121f   :  { %1601 = vrot.lane.b32.xlu0 %v1594_v7, %s2049_s20 }
0x1250   :  { %v1514_v16 = vpop.permute.xlu1 %1513 }
0x1251   :  { %1516 = vst.msk [vmem:[#allocation6] sm:$0xff] %vm65_vm0, %v1514_v16 }
0x1257   :  { %v1509_v17 = vpop.permute.xlu0 %1508 }
0x1258   :  { %v1511_v41 = vmul.f32 %v1509_v17, %v1487_v6  ;;  %v1684_v42 = vld [vmem:[#allocation6] sm:$0xff] }
0x1259   :  { %1686 = vrot.lane.b32.xlu0 %v1684_v42, %s2049_s20 }
0x125a   :  { %1518 = vrot.lane.b32.xlu2 %v1511_v41, %s2049_s20 }
0x1291   :  { %v1602_v44 = vpop.permute.xlu0 %1601 }
0x1292   :  { %1604 = vst.msk [vmem:[#allocation3] sm:$0xff] %vm65_vm0, %v1602_v44  ;;  %1813 = vmatmul.msk.f32.vlgmr.msrb.gmra.mxu2 %vm65_vm0, %v1602_v44 }
0x12b4   :  { %v1519_v48 = vpop.permute.xlu2 %1518 }
0x12b5   :  { %1521 = vst.msk [vmem:[#allocation5] sm:$0xff] %vm65_vm0, %v1519_v48 }
0x12bc   :  { %v1635_v18 = vld [vmem:[#allocation5] sm:$0xff] }
0x12bd   :  { %1814 = vmatmul.msk.f32.vlgmr.msrb.gmra.mxu3 %vm65_vm0, %v1635_v18 }
0x12cb   :  { %v1687_v38 = vpop.permute.xlu0 %1686 }
0x1315   :  { %v1632_v19 = vpop.f32.mrf.mxu2 }
0x1316   :  { %v1633_v20 = vadd.f32 %v1834_v12, %v1632_v19 }
0x1340   :  { %v1660_v21 = vpop.f32.mrf.mxu3 }
0x1341   :  { %v1663_v22 = vadd.f32 %v1660_v21, %v1633_v20 }
0x1343   :  { %1956 = vtanh.f32 %v1663_v22  ;;  %v1815_v24 = vmul.f32 -1.442695, %v1663_v22 }
0x1345   :  { %1958 = vpow2.f32 %v1815_v24 }
0x1349   :  { %v1957_v23 = vpop.eup %1956 }
0x134a   :  { %1691 = vrot.lane.b32.xlu2 %v1957_v23, %s2048_s19 }
0x134b   :  { %v1959_v25 = vpop.eup %1958 }
0x134c   :  { %v1667_v26 = vadd.f32 1.0, %v1959_v25 }
0x134e   :  { %1960 = vrcp.f32 %v1667_v26  ;;  %v1679_v32 = vand.u32 2147483648, %v1667_v26  ;;  %vm1673_vm7 = vweird.f32 %v1667_v26  ;;  %v1677_v8 = vand.u32 2147483647, %v1667_v26 }
0x1350   :  { %v1680_v34 = vor.u32 1.1754944e-38, %v1679_v32  ;;  %vm1678_vm9 = vcmp.eq.f32.partialorder %v1677_v8, 8.507059e+37 }
0x1354   :  { %v1961_v27 = vpop.eup %1960 }
0x1355   :  { %v1669_v28 = vmul.f32 %v1961_v27, %v1667_v26  ;;  %vm1674_vm6 = vweird.f32 %v1961_v27 }
0x1356   :  { %vm1675_vm8 = vmor %vm1673_vm7, %vm1674_vm6 }
0x1357   :  { %v1670_v29 = vsub.f32 1.0, %v1669_v28 }
0x1359   :  { %v1671_v30 = vmul.f32 %v1961_v27, %v1670_v29 }
0x135b   :  { %v1672_v31 = vadd.f32 %v1961_v27, %v1671_v30 }
0x135d   :  { %v1676_v33 = vsel %vm1675_vm8, %v1961_v27, %v1672_v31 }
0x135e   :  { %v1681_v36 = vsel %vm1678_vm9, %v1680_v34, %v1676_v33 }
0x135f   :  { %v1689_v46 = vmul.f32 %v1687_v38, %v1681_v36 }
0x13a4   :  { %v1692_v35 = vpop.permute.xlu2 %1691 }
0x13a5   :  { %v1694_v37 = vmul.f32 %v1692_v35, %v1681_v36 }
0x13a7   :  { %1696 = vrot.lane.b32.xlu1 %v1694_v37, %s2049_s20 }
0x13af   :  { %1596 = vrot.lane.b32.xlu1 %v1588_v4, %s2050_s27 }
0x1419   :  { %v1697_v47 = vpop.permute.xlu1 %1696 }
0x141a   :  { %v1699_v49 = vadd.f32 %v1697_v47, %v1689_v46 }
0x141c   :  { %1962 = vtanh.f32 %v1699_v49 }
0x1421   :  { %v1597_v50 = vpop.permute.xlu1 %1596 }
0x1422   :  { %v1963_v51 = vpop.eup %1962  ;;  %1599 = vst.msk [vmem:[#allocation4] sm:$0xff] %vm65_vm0, %v1597_v50 }
0x1423   :  { %1702 = vrot.lane.b32.xlu2 %v1963_v51, %s2048_s19 }
0x142b   :  { %1707 = vrot.lane.b32.xlu2 %v1699_v49, %s2050_s27 }
0x147d   :  { %v1703_v52 = vpop.permute.xlu2 %1702 }
0x147e   :  { %v1705_v53 = vmul.f32 %v1703_v52, %v1681_v36 }
0x1480   :  { %1712 = vrot.lane.b32.xlu0 %v1705_v53, %s2049_s20  ;;  %s2051_s20 = smov [#allocation12]  }
0x1481   :  { %s1754_s27 = sshll.u32 %s2051_s20, 4  ;;  %s1755_s27 = int_to_ptr.vmem [resolvable:$true] %s1754_s27 }
0x1485   :  { %v1708_v54 = vpop.permute.xlu2 %1707 }
0x1486   :  { %1710 = vst.msk [vmem:[#allocation6] sm:$0xff] %vm65_vm0, %v1708_v54 }
0x14f2   :  { %v1713_v59 = vpop.permute.xlu0 %1712 }
0x14f3   :  { %1715 = vst.msk [vmem:[#allocation5] sm:$0xff] %vm65_vm0, %v1713_v59 }
0x14fa   :  { %v1716_v60 = vld [vmem:[#allocation5] sm:$0xff] }
0x14fb   :  { %1816 = vmatmul.msk.f32.vlgmr.msra.gmra.mxu1 %vm65_vm0, %v1716_v60 }
0x1578   :  { %v1745_v62 = vpop.f32.mrf.mxu1 }
0x1579   :  { %v1746_v63 = vadd.f32 %v1835_v61, %v1745_v62 }
0x157b   :  { %1748 = vst [vmem:[#allocation12] sm:$0xff] %v1746_v63 }
0x157c   :  { %1759 = dma.vmem_to_hbm [thread:$0]  %s1755_s27, 128, %s1757_s11, [#allocation9]  }
0x157d   :  { %2041 = dma.done.wait [#allocation9], 128  }
0x157e   :  { %2042 = vsyncadd [#allocation9], 4294967168 }
0x157f   :  { %1764 = vsyncpa [#allocation8], 1 }
0x1580   :  { %1765 = vsyncpa [#allocation11], 1 }
0x1581   :  { %1766 = vsyncpa [#allocation9], 1 }

</bundles_post_ra>
